<compile_context>
chip_gen: v6e
topology: v6e:2x2x1
jax: 0.10.0
libtpu: 0.0.40
codegen_flags: <defaults>
</compile_context>

<pallas_src>
import functools

import jax
import jax.numpy as jnp
from jax import lax
from jax.experimental import pallas as pl
from jax.experimental.pallas import tpu as pltpu


# ------------------------------- fused kernel -------------------------------- #

def _bottleneck_kernel(x_ref, w1_ref, w2_ref, w3_ref, b1_ref, b2_ref, b3_ref,
                       o_ref, t1_ref, *, TH, W, HT, OFF):
    """One (image n, row-tile h) step of the fused Bottleneck block.

    x_ref : (H*W, Cin)        whole image, channels-last flat-spatial; resident
                              in VMEM across the h axis (index_map depends on n)
    w2_ref: (3, 3*Cmid, Cmid) per-dy K-concatenated 3x3 taps (scales folded in)
    o_ref : (TH*W, Cout)      output row-tile
    t1_ref: (2*OFF + (TH+2)*W, Cmid) scratch: conv1 output for the tile plus a
            one-row halo (reproduces the 3x3 conv's H padding); OFF-row head and
            tail lead-ins stay zero for the masked corner taps.
    """
    h = pl.program_id(1)
    p0 = pl.multiple_of(h * (TH * W), TH * W)     # first flat pixel of this tile
    pm = pl.multiple_of(p0 - W, W)                # one row above (used when h>0)
    f32 = jnp.float32
    dt = t1_ref.dtype
    Cmid = w1_ref.shape[1]

    def conv1(px):                                # relu(conv1x1(px) + b1); s1 folded
        y = jnp.dot(px, w1_ref[...], preferred_element_type=f32)
        return jnp.maximum(y + b1_ref[...], 0.0).astype(dt)

    # ---- stage 1: conv1 over tile + 1-row halo, zero-bordered in H ------------
    zoff = jnp.zeros((OFF, Cmid), dt)
    zrow = jnp.zeros((W, Cmid), dt)
    t1_ref[pl.ds(0, OFF), :] = zoff                         # head lead-in
    t1_ref[pl.ds(OFF + (TH + 2) * W, OFF), :] = zoff        # tail lead-in

    if HT == 1:                                   # single tile: both halos are pad
        t1_ref[pl.ds(OFF, W), :] = zrow
        t1_ref[pl.ds(OFF + (TH + 1) * W, W), :] = zrow
        t1_ref[pl.ds(OFF + W, TH * W), :] = conv1(x_ref[pl.ds(p0, TH * W), :])
    else:
        @pl.when(jnp.logical_and(h > 0, h < HT - 1))
        def _():                                  # interior: one (TH+2)*W matmul
            t1_ref[pl.ds(OFF, (TH + 2) * W), :] = conv1(
                x_ref[pl.ds(pm, (TH + 2) * W), :])

        @pl.when(h == 0)
        def _():                                  # top tile: halo-above is padding
            t1_ref[pl.ds(OFF, W), :] = zrow
            t1_ref[pl.ds(OFF + W, (TH + 1) * W), :] = conv1(
                x_ref[pl.ds(p0, (TH + 1) * W), :])

        @pl.when(h == HT - 1)
        def _():                                  # bottom tile: halo-below is padding
            t1_ref[pl.ds(OFF + (TH + 1) * W, W), :] = zrow
            t1_ref[pl.ds(OFF, (TH + 1) * W), :] = conv1(
                x_ref[pl.ds(pm, (TH + 1) * W), :])

    # ---- stage 2: 3x3 conv (pad=1) with per-dy K-concat of the 3 dx taps ------
    # tap (dy,dx) is the contiguous t1 slice starting at OFF + dy*W + dx - 1;
    # the column wrap-around of the dx=0 / dx=2 taps is masked on the LHS slabs.
    col = lax.broadcasted_iota(jnp.int32, (TH * W, 1), 0) % W
    ml = (col != 0).astype(dt)                    # kills wrap at output column 0
    mr = (col != W - 1).astype(dt)                # kills wrap at output column W-1

    def dy_term(dy):
        base = OFF + dy * W
        lhs = jnp.concatenate(
            [t1_ref[pl.ds(base - 1, TH * W), :] * ml,
             t1_ref[pl.ds(base,     TH * W), :],
             t1_ref[pl.ds(base + 1, TH * W), :] * mr], axis=-1)
        return jnp.dot(lhs, w2_ref[dy], preferred_element_type=f32)

    t2 = jnp.maximum(dy_term(0) + dy_term(1) + dy_term(2) + b2_ref[...], 0.0)

    # ---- stage 3: conv1x1 + b3 + identity residual + relu ---------------------
    x_tile = x_ref[pl.ds(p0, TH * W), :]
    y = jnp.dot(t2.astype(w3_ref.dtype), w3_ref[...], preferred_element_type=f32)
    y = y + b3_ref[...] + x_tile.astype(f32)
    o_ref[...] = jnp.maximum(y, 0.0).astype(o_ref.dtype)


# --------------------------------- wrapper ----------------------------------- #

def _single_buffered(shape, index_map):
    """Constant-index blocks: their index_map never changes, so request single
    buffering (falls back to default double buffering on older BlockSpec)."""
    try:
        return pl.BlockSpec(shape, index_map, pipeline_mode=pl.Buffered(1))
    except TypeError:                       # pipeline_mode not supported
        return pl.BlockSpec(shape, index_map)


def bottleneck_forward(x_nchw, params, *, tile_h=8):
    """Bottleneck forward, stride=1, downsample=None (identity residual)."""
    N, Cin, H, W = x_nchw.shape
    w1, w2, w3 = params["w1"], params["w2"], params["w3"]
    Cmid, Cout = w1.shape[1], w3.shape[1]
    assert Cin == Cout, "identity residual needs inplanes == planes * expansion"

    TH = tile_h if H % tile_h == 0 else H         # row tile (1-row halo each side)
    HT = H // TH
    assert (TH * W) % 8 == 0 and (H * W) % 8 == 0

    # channels-last, flat-spatial (pixels x C); layout-free reshapes.
    x2d = jnp.transpose(x_nchw, (0, 2, 3, 1)).reshape(N * H * W, Cin)

    # Fold BN scales into the conv weights (one-time XLA prep); keep biases f32.
    w1f = (w1 * params["s1"]).astype(x2d.dtype)                               # (Cin, Cmid)
    w2f = (w2 * params["s2"]).reshape(3, 3 * Cmid, Cmid).astype(x2d.dtype)    # per-dy (dx,ci) K-concat
    w3f = (w3 * params["s3"]).astype(x2d.dtype)                               # (Cmid, Cout)
    b1 = params["b1"].astype(jnp.float32)
    b2 = params["b2"].astype(jnp.float32)
    b3 = params["b3"].astype(jnp.float32)

    OFF = 8                                       # zero lead-in; keeps stores aligned
    scratch_rows = 2 * OFF + (TH + 2) * W

    kernel = functools.partial(_bottleneck_kernel, TH=TH, W=W, HT=HT, OFF=OFF)
    const = lambda n, h: (0, 0)
    const3 = lambda n, h: (0, 0, 0)

    out2d = pl.pallas_call(
        kernel,
        out_shape=jax.ShapeDtypeStruct((N * H * W, Cout), x2d.dtype),
        grid_spec=pltpu.PrefetchScalarGridSpec(
            num_scalar_prefetch=0,
            grid=(N, HT),
            in_specs=[
                pl.BlockSpec((H * W, Cin), lambda n, h: (n, 0)),   # x (per image, VMEM-resident)
                _single_buffered((Cin, Cmid), const),              # w1 * s1
                _single_buffered((3, 3 * Cmid, Cmid), const3),     # w2 * s2 (per-dy taps)
                _single_buffered((Cmid, Cout), const),             # w3 * s3
                _single_buffered((1, Cmid), const),                # b1
                _single_buffered((1, Cmid), const),                # b2
                _single_buffered((1, Cout), const),                # b3
            ],
            out_specs=pl.BlockSpec((TH * W, Cout), lambda n, h: (n * HT + h, 0)),
            scratch_shapes=[pltpu.VMEM((scratch_rows, Cmid), x2d.dtype)],
        ),
        compiler_params=pltpu.CompilerParams(
            # both axes independent; on v7x ensure the sharded axis extent >= 2.
            dimension_semantics=("parallel", "parallel"),
            # 32 MiB is ample here; raise on v5e/v6e (128 MiB physical) for deep
            # layers / larger tile_h, re-derive for v7x (64 MiB VMEM per TC).
            vmem_limit_bytes=32 * 1024 * 1024,
        ),
    )(x2d, w1f, w2f, w3f, b1, b2, b3)

    return jnp.transpose(out2d.reshape(N, H, W, Cout), (0, 3, 1, 2))


# ------------------------------ plain-JAX reference --------------------------- #

def fold_bn(gamma, beta, mean, var, eps=1e-5):
    scale = gamma / jnp.sqrt(var + eps)
    bias = beta - mean * scale
    return scale.reshape(1, -1), bias.reshape(1, -1)


def reference_forward(x_nchw, params):
    x = jnp.transpose(x_nchw, (0, 2, 3, 1))
    dn = ("NHWC", "HWIO", "NHWC")

    def conv(x, w_hwio, stride=1, pad=0):
        return lax.conv_general_dilated(
            x, w_hwio, window_strides=(stride, stride),
            padding=[(pad, pad), (pad, pad)], dimension_numbers=dn)

    out = conv(x, params["w1"].reshape(1, 1, *params["w1"].shape))
    out = jnp.maximum(out * params["s1"] + params["b1"], 0.0)
    out = conv(out, params["w2"], stride=1, pad=1)
    out = jnp.maximum(out * params["s2"] + params["b2"], 0.0)
    out = conv(out, params["w3"].reshape(1, 1, *params["w3"].shape))
    out = out * params["s3"] + params["b3"]
    out = jnp.maximum(out + x, 0.0)
    return jnp.transpose(out, (0, 3, 1, 2))


# ------------------------------------ main ------------------------------------ #

if __name__ == "__main__":
    # planes=4, inplanes=planes*expansion=16 so the identity residual applies;
    # stride=1, downsample=None.  N=2, H=W=16.
    planes, expansion = 4, 4
    inplanes = planes * expansion
    N, H, W = 2, 16, 16

    key = jax.random.PRNGKey(0)
    ks = jax.random.split(key, 16)

    x = jax.random.normal(ks[0], (N, inplanes, H, W), jnp.float32)

    w1 = 0.1 * jax.random.normal(ks[1], (inplanes, planes), jnp.float32)
    w2 = 0.1 * jax.random.normal(ks[2], (3, 3, planes, planes), jnp.float32)
    w3 = 0.1 * jax.random.normal(ks[3], (planes, planes * expansion), jnp.float32)

    def bn_params(kg, kb, km, kv, c):
        gamma = 1.0 + 0.1 * jax.random.normal(kg, (c,), jnp.float32)
        beta = 0.1 * jax.random.normal(kb, (c,), jnp.float32)
        mean = 0.1 * jax.random.normal(km, (c,), jnp.float32)
        var = jnp.abs(jax.random.normal(kv, (c,), jnp.float32)) + 0.5
        return fold_bn(gamma, beta, mean, var)

    s1, b1 = bn_params(ks[4], ks[5], ks[6], ks[7], planes)
    s2, b2 = bn_params(ks[8], ks[9], ks[10], ks[11], planes)
    s3, b3 = bn_params(ks[12], ks[13], ks[14], ks[15], planes * expansion)

    params = dict(w1=w1, w2=w2, w3=w3, s1=s1, b1=b1, s2=s2, b2=b2, s3=s3, b3=b3)

    fwd = jax.jit(bottleneck_forward)
    ref_fn = jax.jit(reference_forward)

    out = jax.block_until_ready(fwd(x, params))
    ref = jax.block_until_ready(ref_fn(x, params))

    assert out.shape == (N, planes * expansion, H, W), out.shape
    max_err = float(jnp.max(jnp.abs(out - ref)))
    assert jnp.allclose(out, ref, atol=2e-4, rtol=2e-4), max_err
    print("KERNEL_OK")
</pallas_src>

<mosaic_0001>
module attributes {stable_mosaic.version = 11 : i64} {
  func.func @_bottleneck_kernel(%arg0: i32, %arg1: i32, %arg2: memref<256x16xf32, #tpu.memory_space<vmem>>, %arg3: memref<16x4xf32, #tpu.memory_space<vmem>>, %arg4: memref<3x12x4xf32, #tpu.memory_space<vmem>>, %arg5: memref<4x16xf32, #tpu.memory_space<vmem>>, %arg6: memref<1x4xf32, #tpu.memory_space<vmem>>, %arg7: memref<1x4xf32, #tpu.memory_space<vmem>>, %arg8: memref<1x16xf32, #tpu.memory_space<vmem>>, %arg9: memref<128x16xf32, #tpu.memory_space<vmem>>, %arg10: memref<176x4xf32, #tpu.memory_space<vmem>>) attributes {dimension_semantics = [#tpu.dimension_semantics<parallel>, #tpu.dimension_semantics<parallel>], iteration_bounds = array<i64: 2, 2>, scalar_prefetch = 0 : i64, scratch_operands = 1 : i64, tpu.core_type = #tpu.core_type<tc>, window_params = [{transform_indices = @transform_0, window_bounds = array<i64: 256, 16>}, {pipeline_mode = #tpu.pipeline_mode<synchronous>, transform_indices = @transform_1, window_bounds = array<i64: 16, 4>}, {pipeline_mode = #tpu.pipeline_mode<synchronous>, transform_indices = @transform_2, window_bounds = array<i64: 3, 12, 4>}, {pipeline_mode = #tpu.pipeline_mode<synchronous>, transform_indices = @transform_3, window_bounds = array<i64: 4, 16>}, {pipeline_mode = #tpu.pipeline_mode<synchronous>, transform_indices = @transform_4, window_bounds = array<i64: 1, 4>}, {pipeline_mode = #tpu.pipeline_mode<synchronous>, transform_indices = @transform_5, window_bounds = array<i64: 1, 4>}, {pipeline_mode = #tpu.pipeline_mode<synchronous>, transform_indices = @transform_6, window_bounds = array<i64: 1, 16>}, {transform_indices = @transform_7, window_bounds = array<i64: 128, 16>}]} {
    %c128_i32 = arith.constant 128 : i32
    %0 = arith.muli %arg1, %c128_i32 : i32
    %1 = tpu.assume_multiple %0, 128 : i32
    %c16_i32 = arith.constant 16 : i32
    %2 = arith.subi %1, %c16_i32 : i32
    %3 = tpu.assume_multiple %2, 16 : i32
    %cst = arith.constant 0.000000e+00 : f32
    %4 = vector.broadcast %cst : f32 to vector<8x4xf32>
    %cst_0 = arith.constant 0.000000e+00 : f32
    %5 = vector.broadcast %cst_0 : f32 to vector<16x4xf32>
    %c0 = arith.constant 0 : index
    %c0_1 = arith.constant 0 : index
    %6 = vector.load %arg10[%c0, %c0_1] : memref<176x4xf32, #tpu.memory_space<vmem>>, vector<8x4xf32>
    tpu.vector_store %arg10[%c0, %c0_1], %4 {strides = array<i32>} : memref<176x4xf32, #tpu.memory_space<vmem>>, vector<8x4xf32>,
    %c168 = arith.constant 168 : index
    %c0_2 = arith.constant 0 : index
    %7 = vector.load %arg10[%c168, %c0_2] : memref<176x4xf32, #tpu.memory_space<vmem>>, vector<8x4xf32>
    tpu.vector_store %arg10[%c168, %c0_2], %4 {strides = array<i32>} : memref<176x4xf32, #tpu.memory_space<vmem>>, vector<8x4xf32>,
    %c0_i32 = arith.constant 0 : i32
    %8 = arith.cmpi sgt, %arg1, %c0_i32 : i32
    %c1_i32 = arith.constant 1 : i32
    %9 = arith.cmpi slt, %arg1, %c1_i32 : i32
    %10 = arith.andi %8, %9 : i1
    %11 = arith.extui %10 : i1 to i32
    %c0_i32_3 = arith.constant 0 : i32
    %12 = arith.cmpi ne, %11, %c0_i32_3 : i32
    scf.if %12 {
      %95 = arith.index_cast %3 : i32 to index
      %c0_46 = arith.constant 0 : index
      %96 = vector.load %arg2[%95, %c0_46] : memref<256x16xf32, #tpu.memory_space<vmem>>, vector<160x16xf32>
      %c0_47 = arith.constant 0 : index
      %c0_48 = arith.constant 0 : index
      %97 = vector.load %arg3[%c0_47, %c0_48] : memref<16x4xf32, #tpu.memory_space<vmem>>, vector<16x4xf32>
      %cst_49 = arith.constant dense<0.000000e+00> : vector<160x4xf32>
      %98 = tpu.matmul %96, %97, %cst_49 {dimension_numbers = #tpu.dot_dimension_numbers<[1], [0], [0], [1], [0, 0, 1, 1], [], []>} : vector<160x16xf32>, vector<16x4xf32>, vector<160x4xf32> -> vector<160x4xf32>
      %c0_50 = arith.constant 0 : index
      %c0_51 = arith.constant 0 : index
      %99 = vector.load %arg6[%c0_50, %c0_51] : memref<1x4xf32, #tpu.memory_space<vmem>>, vector<1x4xf32>
      %100 = vector.broadcast %99 : vector<1x4xf32> to vector<160x4xf32>
      %101 = arith.addf %98, %100 : vector<160x4xf32>
      %cst_52 = arith.constant 0.000000e+00 : f32
      %102 = vector.broadcast %cst_52 : f32 to vector<160x4xf32>
      %103 = arith.maximumf %101, %102 : vector<160x4xf32>
      %c8_53 = arith.constant 8 : index
      %c0_54 = arith.constant 0 : index
      %104 = vector.load %arg10[%c8_53, %c0_54] : memref<176x4xf32, #tpu.memory_space<vmem>>, vector<160x4xf32>
      tpu.vector_store %arg10[%c8_53, %c0_54], %103 {strides = array<i32>} : memref<176x4xf32, #tpu.memory_space<vmem>>, vector<160x4xf32>,
    } else {
    }
    %c0_i32_4 = arith.constant 0 : i32
    %13 = arith.cmpi eq, %arg1, %c0_i32_4 : i32
    %14 = arith.extui %13 : i1 to i32
    %c0_i32_5 = arith.constant 0 : i32
    %15 = arith.cmpi ne, %14, %c0_i32_5 : i32
    scf.if %15 {
      %c8_46 = arith.constant 8 : index
      %c0_47 = arith.constant 0 : index
      %95 = vector.load %arg10[%c8_46, %c0_47] : memref<176x4xf32, #tpu.memory_space<vmem>>, vector<16x4xf32>
      tpu.vector_store %arg10[%c8_46, %c0_47], %5 {strides = array<i32>} : memref<176x4xf32, #tpu.memory_space<vmem>>, vector<16x4xf32>,
      %96 = arith.index_cast %1 : i32 to index
      %c0_48 = arith.constant 0 : index
      %97 = vector.load %arg2[%96, %c0_48] : memref<256x16xf32, #tpu.memory_space<vmem>>, vector<144x16xf32>
      %c0_49 = arith.constant 0 : index
      %c0_50 = arith.constant 0 : index
      %98 = vector.load %arg3[%c0_49, %c0_50] : memref<16x4xf32, #tpu.memory_space<vmem>>, vector<16x4xf32>
      %cst_51 = arith.constant dense<0.000000e+00> : vector<144x4xf32>
      %99 = tpu.matmul %97, %98, %cst_51 {dimension_numbers = #tpu.dot_dimension_numbers<[1], [0], [0], [1], [0, 0, 1, 1], [], []>} : vector<144x16xf32>, vector<16x4xf32>, vector<144x4xf32> -> vector<144x4xf32>
      %c0_52 = arith.constant 0 : index
      %c0_53 = arith.constant 0 : index
      %100 = vector.load %arg6[%c0_52, %c0_53] : memref<1x4xf32, #tpu.memory_space<vmem>>, vector<1x4xf32>
      %101 = vector.broadcast %100 : vector<1x4xf32> to vector<144x4xf32>
      %102 = arith.addf %99, %101 : vector<144x4xf32>
      %cst_54 = arith.constant 0.000000e+00 : f32
      %103 = vector.broadcast %cst_54 : f32 to vector<144x4xf32>
      %104 = arith.maximumf %102, %103 : vector<144x4xf32>
      %c24_55 = arith.constant 24 : index
      %c0_56 = arith.constant 0 : index
      %105 = vector.load %arg10[%c24_55, %c0_56] : memref<176x4xf32, #tpu.memory_space<vmem>>, vector<144x4xf32>
      tpu.vector_store %arg10[%c24_55, %c0_56], %104 {strides = array<i32>} : memref<176x4xf32, #tpu.memory_space<vmem>>, vector<144x4xf32>,
    } else {
    }
    %c1_i32_6 = arith.constant 1 : i32
    %16 = arith.cmpi eq, %arg1, %c1_i32_6 : i32
    %17 = arith.extui %16 : i1 to i32
    %c0_i32_7 = arith.constant 0 : i32
    %18 = arith.cmpi ne, %17, %c0_i32_7 : i32
    scf.if %18 {
      %c152 = arith.constant 152 : index
      %c0_46 = arith.constant 0 : index
      %95 = vector.load %arg10[%c152, %c0_46] : memref<176x4xf32, #tpu.memory_space<vmem>>, vector<16x4xf32>
      tpu.vector_store %arg10[%c152, %c0_46], %5 {strides = array<i32>} : memref<176x4xf32, #tpu.memory_space<vmem>>, vector<16x4xf32>,
      %96 = arith.index_cast %3 : i32 to index
      %c0_47 = arith.constant 0 : index
      %97 = vector.load %arg2[%96, %c0_47] : memref<256x16xf32, #tpu.memory_space<vmem>>, vector<144x16xf32>
      %c0_48 = arith.constant 0 : index
      %c0_49 = arith.constant 0 : index
      %98 = vector.load %arg3[%c0_48, %c0_49] : memref<16x4xf32, #tpu.memory_space<vmem>>, vector<16x4xf32>
      %cst_50 = arith.constant dense<0.000000e+00> : vector<144x4xf32>
      %99 = tpu.matmul %97, %98, %cst_50 {dimension_numbers = #tpu.dot_dimension_numbers<[1], [0], [0], [1], [0, 0, 1, 1], [], []>} : vector<144x16xf32>, vector<16x4xf32>, vector<144x4xf32> -> vector<144x4xf32>
      %c0_51 = arith.constant 0 : index
      %c0_52 = arith.constant 0 : index
      %100 = vector.load %arg6[%c0_51, %c0_52] : memref<1x4xf32, #tpu.memory_space<vmem>>, vector<1x4xf32>
      %101 = vector.broadcast %100 : vector<1x4xf32> to vector<144x4xf32>
      %102 = arith.addf %99, %101 : vector<144x4xf32>
      %cst_53 = arith.constant 0.000000e+00 : f32
      %103 = vector.broadcast %cst_53 : f32 to vector<144x4xf32>
      %104 = arith.maximumf %102, %103 : vector<144x4xf32>
      %c8_54 = arith.constant 8 : index
      %c0_55 = arith.constant 0 : index
      %105 = vector.load %arg10[%c8_54, %c0_55] : memref<176x4xf32, #tpu.memory_space<vmem>>, vector<144x4xf32>
      tpu.vector_store %arg10[%c8_54, %c0_55], %104 {strides = array<i32>} : memref<176x4xf32, #tpu.memory_space<vmem>>, vector<144x4xf32>,
    } else {
    }
    %19 = tpu.iota {dimensions = array<i32: 0>} : vector<128x1xi32>
    %c16_i32_8 = arith.constant 16 : i32
    %c0_i32_9 = arith.constant 0 : i32
    %20 = arith.cmpi eq, %c16_i32_8, %c0_i32_9 : i32
    %c1_i32_10 = arith.constant 1 : i32
    %21 = arith.select %20, %c1_i32_10, %c16_i32_8 : i32
    %22 = vector.broadcast %21 : i32 to vector<128x1xi32>
    %23 = arith.remsi %19, %22 : vector<128x1xi32>
    %c0_i32_11 = arith.constant 0 : i32
    %24 = vector.broadcast %c0_i32_11 : i32 to vector<128x1xi32>
    %25 = arith.cmpi ne, %23, %24 : vector<128x1xi32>
    %c0_i32_12 = arith.constant 0 : i32
    %26 = vector.broadcast %c0_i32_12 : i32 to vector<128x1xi32>
    %27 = arith.cmpi slt, %23, %26 : vector<128x1xi32>
    %c0_i32_13 = arith.constant 0 : i32
    %28 = arith.cmpi slt, %21, %c0_i32_13 : i32
    %29 = vector.broadcast %28 : i1 to vector<128x1xi1>
    %30 = vector.broadcast %29 : vector<128x1xi1> to vector<128x1xi1>
    %31 = arith.xori %27, %30 : vector<128x1xi1>
    %32 = arith.andi %31, %25 : vector<128x1xi1>
    %33 = vector.broadcast %21 : i32 to vector<128x1xi32>
    %34 = arith.addi %23, %33 : vector<128x1xi32>
    %35 = arith.select %32, %34, %23 : vector<128x1xi1>, vector<128x1xi32>
    %c0_i32_14 = arith.constant 0 : i32
    %36 = vector.broadcast %c0_i32_14 : i32 to vector<128x1xi32>
    %37 = arith.cmpi ne, %35, %36 : vector<128x1xi32>
    %38 = arith.extui %37 : vector<128x1xi1> to vector<128x1xi32>
    %39 = arith.sitofp %38 : vector<128x1xi32> to vector<128x1xf32>
    %c15_i32 = arith.constant 15 : i32
    %40 = vector.broadcast %c15_i32 : i32 to vector<128x1xi32>
    %41 = arith.cmpi ne, %35, %40 : vector<128x1xi32>
    %42 = arith.extui %41 : vector<128x1xi1> to vector<128x1xi32>
    %43 = arith.sitofp %42 : vector<128x1xi32> to vector<128x1xf32>
    %c7 = arith.constant 7 : index
    %c0_15 = arith.constant 0 : index
    %44 = vector.load %arg10[%c7, %c0_15] : memref<176x4xf32, #tpu.memory_space<vmem>>, vector<128x4xf32>
    %45 = vector.broadcast %39 : vector<128x1xf32> to vector<128x4xf32>
    %46 = arith.mulf %44, %45 : vector<128x4xf32>
    %c8 = arith.constant 8 : index
    %c0_16 = arith.constant 0 : index
    %47 = vector.load %arg10[%c8, %c0_16] : memref<176x4xf32, #tpu.memory_space<vmem>>, vector<128x4xf32>
    %c9 = arith.constant 9 : index
    %c0_17 = arith.constant 0 : index
    %48 = vector.load %arg10[%c9, %c0_17] : memref<176x4xf32, #tpu.memory_space<vmem>>, vector<128x4xf32>
    %49 = vector.broadcast %43 : vector<128x1xf32> to vector<128x4xf32>
    %50 = arith.mulf %48, %49 : vector<128x4xf32>
    %51 = tpu.concatenate %46, %47, %50 in 1 : vector<128x4xf32>, vector<128x4xf32>, vector<128x4xf32> -> vector<128x12xf32>
    %c0_18 = arith.constant 0 : index
    %c0_19 = arith.constant 0 : index
    %c0_20 = arith.constant 0 : index
    %52 = vector.load %arg4[%c0_18, %c0_19, %c0_20] : memref<3x12x4xf32, #tpu.memory_space<vmem>>, vector<1x12x4xf32>
    %53 = vector.shape_cast %52 : vector<1x12x4xf32> to vector<12x4xf32>
    %cst_21 = arith.constant dense<0.000000e+00> : vector<128x4xf32>
    %54 = tpu.matmul %51, %53, %cst_21 {dimension_numbers = #tpu.dot_dimension_numbers<[1], [0], [0], [1], [0, 0, 1, 1], [], []>} : vector<128x12xf32>, vector<12x4xf32>, vector<128x4xf32> -> vector<128x4xf32>
    %c23 = arith.constant 23 : index
    %c0_22 = arith.constant 0 : index
    %55 = vector.load %arg10[%c23, %c0_22] : memref<176x4xf32, #tpu.memory_space<vmem>>, vector<128x4xf32>
    %56 = vector.broadcast %39 : vector<128x1xf32> to vector<128x4xf32>
    %57 = arith.mulf %55, %56 : vector<128x4xf32>
    %c24 = arith.constant 24 : index
    %c0_23 = arith.constant 0 : index
    %58 = vector.load %arg10[%c24, %c0_23] : memref<176x4xf32, #tpu.memory_space<vmem>>, vector<128x4xf32>
    %c25 = arith.constant 25 : index
    %c0_24 = arith.constant 0 : index
    %59 = vector.load %arg10[%c25, %c0_24] : memref<176x4xf32, #tpu.memory_space<vmem>>, vector<128x4xf32>
    %60 = vector.broadcast %43 : vector<128x1xf32> to vector<128x4xf32>
    %61 = arith.mulf %59, %60 : vector<128x4xf32>
    %62 = tpu.concatenate %57, %58, %61 in 1 : vector<128x4xf32>, vector<128x4xf32>, vector<128x4xf32> -> vector<128x12xf32>
    %c1 = arith.constant 1 : index
    %c0_25 = arith.constant 0 : index
    %c0_26 = arith.constant 0 : index
    %63 = vector.load %arg4[%c1, %c0_25, %c0_26] : memref<3x12x4xf32, #tpu.memory_space<vmem>>, vector<1x12x4xf32>
    %64 = vector.shape_cast %63 : vector<1x12x4xf32> to vector<12x4xf32>
    %cst_27 = arith.constant dense<0.000000e+00> : vector<128x4xf32>
    %65 = tpu.matmul %62, %64, %cst_27 {dimension_numbers = #tpu.dot_dimension_numbers<[1], [0], [0], [1], [0, 0, 1, 1], [], []>} : vector<128x12xf32>, vector<12x4xf32>, vector<128x4xf32> -> vector<128x4xf32>
    %66 = arith.addf %54, %65 : vector<128x4xf32>
    %c39 = arith.constant 39 : index
    %c0_28 = arith.constant 0 : index
    %67 = vector.load %arg10[%c39, %c0_28] : memref<176x4xf32, #tpu.memory_space<vmem>>, vector<128x4xf32>
    %68 = vector.broadcast %39 : vector<128x1xf32> to vector<128x4xf32>
    %69 = arith.mulf %67, %68 : vector<128x4xf32>
    %c40 = arith.constant 40 : index
    %c0_29 = arith.constant 0 : index
    %70 = vector.load %arg10[%c40, %c0_29] : memref<176x4xf32, #tpu.memory_space<vmem>>, vector<128x4xf32>
    %c41 = arith.constant 41 : index
    %c0_30 = arith.constant 0 : index
    %71 = vector.load %arg10[%c41, %c0_30] : memref<176x4xf32, #tpu.memory_space<vmem>>, vector<128x4xf32>
    %72 = vector.broadcast %43 : vector<128x1xf32> to vector<128x4xf32>
    %73 = arith.mulf %71, %72 : vector<128x4xf32>
    %74 = tpu.concatenate %69, %70, %73 in 1 : vector<128x4xf32>, vector<128x4xf32>, vector<128x4xf32> -> vector<128x12xf32>
    %c2 = arith.constant 2 : index
    %c0_31 = arith.constant 0 : index
    %c0_32 = arith.constant 0 : index
    %75 = vector.load %arg4[%c2, %c0_31, %c0_32] : memref<3x12x4xf32, #tpu.memory_space<vmem>>, vector<1x12x4xf32>
    %76 = vector.shape_cast %75 : vector<1x12x4xf32> to vector<12x4xf32>
    %cst_33 = arith.constant dense<0.000000e+00> : vector<128x4xf32>
    %77 = tpu.matmul %74, %76, %cst_33 {dimension_numbers = #tpu.dot_dimension_numbers<[1], [0], [0], [1], [0, 0, 1, 1], [], []>} : vector<128x12xf32>, vector<12x4xf32>, vector<128x4xf32> -> vector<128x4xf32>
    %78 = arith.addf %66, %77 : vector<128x4xf32>
    %c0_34 = arith.constant 0 : index
    %c0_35 = arith.constant 0 : index
    %79 = vector.load %arg7[%c0_34, %c0_35] : memref<1x4xf32, #tpu.memory_space<vmem>>, vector<1x4xf32>
    %80 = vector.broadcast %79 : vector<1x4xf32> to vector<128x4xf32>
    %81 = arith.addf %78, %80 : vector<128x4xf32>
    %cst_36 = arith.constant 0.000000e+00 : f32
    %82 = vector.broadcast %cst_36 : f32 to vector<128x4xf32>
    %83 = arith.maximumf %81, %82 : vector<128x4xf32>
    %84 = arith.index_cast %1 : i32 to index
    %c0_37 = arith.constant 0 : index
    %85 = vector.load %arg2[%84, %c0_37] : memref<256x16xf32, #tpu.memory_space<vmem>>, vector<128x16xf32>
    %c0_38 = arith.constant 0 : index
    %c0_39 = arith.constant 0 : index
    %86 = vector.load %arg5[%c0_38, %c0_39] : memref<4x16xf32, #tpu.memory_space<vmem>>, vector<4x16xf32>
    %cst_40 = arith.constant dense<0.000000e+00> : vector<128x16xf32>
    %87 = tpu.matmul %83, %86, %cst_40 {dimension_numbers = #tpu.dot_dimension_numbers<[1], [0], [0], [1], [0, 0, 1, 1], [], []>} : vector<128x4xf32>, vector<4x16xf32>, vector<128x16xf32> -> vector<128x16xf32>
    %c0_41 = arith.constant 0 : index
    %c0_42 = arith.constant 0 : index
    %88 = vector.load %arg8[%c0_41, %c0_42] : memref<1x16xf32, #tpu.memory_space<vmem>>, vector<1x16xf32>
    %89 = vector.broadcast %88 : vector<1x16xf32> to vector<128x16xf32>
    %90 = arith.addf %87, %89 : vector<128x16xf32>
    %91 = arith.addf %90, %85 : vector<128x16xf32>
    %cst_43 = arith.constant 0.000000e+00 : f32
    %92 = vector.broadcast %cst_43 : f32 to vector<128x16xf32>
    %93 = arith.maximumf %91, %92 : vector<128x16xf32>
    %c0_44 = arith.constant 0 : index
    %c0_45 = arith.constant 0 : index
    %94 = vector.load %arg9[%c0_44, %c0_45] : memref<128x16xf32, #tpu.memory_space<vmem>>, vector<128x16xf32>
    tpu.vector_store %arg9[%c0_44, %c0_45], %93 {strides = array<i32>} : memref<128x16xf32, #tpu.memory_space<vmem>>, vector<128x16xf32>,
    return
  }
  func.func @transform_0(%arg0: i32, %arg1: i32) -> (i32, i32) {
    %c0_i32 = arith.constant 0 : i32
    %c0_i32_0 = arith.constant 0 : i32
    return %arg0, %c0_i32 : i32, i32
  }
  func.func @transform_1(%arg0: i32, %arg1: i32) -> (i32, i32) {
    %c0_i32 = arith.constant 0 : i32
    %c0_i32_0 = arith.constant 0 : i32
    %c0_i32_1 = arith.constant 0 : i32
    return %c0_i32, %c0_i32_0 : i32, i32
  }
  func.func @transform_2(%arg0: i32, %arg1: i32) -> (i32, i32, i32) {
    %c0_i32 = arith.constant 0 : i32
    %c0_i32_0 = arith.constant 0 : i32
    %c0_i32_1 = arith.constant 0 : i32
    %c0_i32_2 = arith.constant 0 : i32
    return %c0_i32, %c0_i32_0, %c0_i32_1 : i32, i32, i32
  }
  func.func @transform_3(%arg0: i32, %arg1: i32) -> (i32, i32) {
    %c0_i32 = arith.constant 0 : i32
    %c0_i32_0 = arith.constant 0 : i32
    %c0_i32_1 = arith.constant 0 : i32
    return %c0_i32, %c0_i32_0 : i32, i32
  }
  func.func @transform_4(%arg0: i32, %arg1: i32) -> (i32, i32) {
    %c0_i32 = arith.constant 0 : i32
    %c0_i32_0 = arith.constant 0 : i32
    %c0_i32_1 = arith.constant 0 : i32
    return %c0_i32, %c0_i32_0 : i32, i32
  }
  func.func @transform_5(%arg0: i32, %arg1: i32) -> (i32, i32) {
    %c0_i32 = arith.constant 0 : i32
    %c0_i32_0 = arith.constant 0 : i32
    %c0_i32_1 = arith.constant 0 : i32
    return %c0_i32, %c0_i32_0 : i32, i32
  }
  func.func @transform_6(%arg0: i32, %arg1: i32) -> (i32, i32) {
    %c0_i32 = arith.constant 0 : i32
    %c0_i32_0 = arith.constant 0 : i32
    %c0_i32_1 = arith.constant 0 : i32
    return %c0_i32, %c0_i32_0 : i32, i32
  }
  func.func @transform_7(%arg0: i32, %arg1: i32) -> (i32, i32) {
    %c2_i32 = arith.constant 2 : i32
    %0 = arith.muli %arg0, %c2_i32 : i32
    %1 = arith.addi %0, %arg1 : i32
    %c0_i32 = arith.constant 0 : i32
    %c0_i32_0 = arith.constant 0 : i32
    return %1, %c0_i32 : i32, i32
  }
}

</mosaic_0001>

<bundles_post_ra>
// kernel: bottleneck_forward.1
= control target key start
LH: loop header
LB: loop body
LE: loop exit
PB: predicated region body
PF: predicated region fallthrough
CT: control target
= control target key end

     0   :  { %s3750_s24 = smov 0   ;;  %s3752_s25 = smov 0   ;;  %s4846_s0 = inlined_call_operand.vmem [shape: f32[512,16], index: 0, kind: input, shape index: {}]   ;;  %s4847_s1 = inlined_call_operand.vmem [shape: f32[16,4], index: 1, kind: input, shape index: {}]   ;;  %s4848_s2 = inlined_call_operand.vmem [shape: f32[3,12,4], index: 2, kind: input, shape index: {}]   ;;  %s4849_s3 = inlined_call_operand.vmem [shape: f32[4,16], index: 3, kind: input, shape index: {}]   ;;  %s4850_s4 = inlined_call_operand.vmem [shape: f32[1,4], index: 4, kind: input, shape index: {}]   ;;  %s4851_s5 = inlined_call_operand.vmem [shape: f32[1,4], index: 5, kind: input, shape index: {}]   ;;  %s4852_s6 = inlined_call_operand.vmem [shape: f32[1,16], index: 6, kind: input, shape index: {}]   ;;  %s4853_s7 = inlined_call_operand.vmem [shape: f32[512,16], index: 7, kind: output, shape index: {}]  }
   0x1   :  { %s3754_s26 = smov 0   ;;  %s3756_s27 = smov 0  }
   0x2   :  { %s3758_s28 = smov 0  }
   0x3 LB: > { %s26_s29 = sadd.s32 1, %s3695_s26  ;;  %s29_s30 = sadd.s32 1, %s3699_s27  ;;  %s3703_s28 = sphi %s3758_s28, %s17_s28   ;;  %s3699_s27 = sphi %s3756_s27, %s4861_s27   ;;  %s3695_s26 = sphi %s3754_s26, %s4860_s26   ;;  %s3691_s25 = sphi %s3752_s25, %s4859_s25   ;;  %s3687_s24 = sphi %s3750_s24, %s4858_s24  }
   0x4   : > { %p27_p0 = scmp.ge.s32.totalorder %s26_s29, 2  ;;  %p3108_p1 = scmp.ge.s32.totalorder %s3703_s28, 1 }
   0x5   : > { %p254_p2 = scmp.lt.s32.totalorder %s3703_s28, 5 }
   0x6   : > { %s4863_s29 = smov (%p27_p0, %s26_s29), 0  ;;  %s4865_s30 = smov (!%p27_p0, %s29_s30), %s3699_s27 }
   0x7   : > { %p255_p3 = pnand %p3108_p1, %p254_p2  ;;  %p31_p4 = scmp.ge.s32.totalorder %s4865_s30, 2 }
   0x8   : > { %s3109_s8 = sshll.u32 (!%p255_p3), %s3691_s25, 5  ;;  %s3111_s9 = sshll.u32 (!%p255_p3), %s3691_s25, 1 }
   0x9   : > { %s4867_s30 = smov (%p31_p4, %s4865_s30), 0  ;;  %258 = sbr.rel (%p255_p3) target bundleno = 1384 (0x568), region = 48 }
   0xa   : > { %p289_p5 = scmp.lt.s32.totalorder (!%p255_p3), %s3109_s8, 63  ;;  %s295_s10 = sadd.s32 (!%p255_p3), %s3687_s24, %s3111_s9 }
   0xb   : > { %s3112_s11 = sshll.u32 (!%p255_p3), %s295_s10, 4  ;;  %s3788_s12 = sshll.u32 (!%p255_p3), %s3687_s24, 7 }
   0xc   : > { %p297_p6 = scmp.lt.s32.totalorder (!%p255_p3), %s3112_s11, 63  ;;  %s3115_s13 = sadd.s32 (!%p255_p3), 4294967280, %s3788_s12 }
   0xd   : > { %p309_p7 = scmp.gt.s32.totalorder (!%p255_p3), %s3687_s24, 0  ;;  %p310_p8 = scmp.lt.s32.totalorder (!%p255_p3), %s3687_s24, 1 }
   0xe   : > { %vm306_vm0 = vcmask 31744   ;;  %v3705_v0 = vmov 0.0   ;;  %s4869_s8 = smov (!%p289_p5, %s3109_s8), 63  ;;  %s4871_s11 = smov (!%p297_p6, %s3112_s11), 63 }
   0xf   : > { %307 = vst.msk [vmem:[#allocation2] sm:$0xff] %vm306_vm0, %v3705_v0  ;;  %308 = vst.msk [vmem:[#allocation2 + $0xa8] sm:$0xff] %vm306_vm0, %v3705_v0  ;;  %s3110_s14 = sshll.u32 %s4869_s8, 3  ;;  %p311_p9 = pnand %p310_p8, %p309_p7 }
  0x10   : > { %s3795_s17 = scalar_lea.vmem %s4846_s0, %s3110_s14  ;;  %s3113_s18 = sshll.u32 %s4871_s11, 3 }
  0x11   : > { %s3801_s21 = scalar_lea.vmem %s4853_s7, %s3113_s18  ;;  %314 = sbr.rel (%p311_p9) target bundleno = 244 (0xf4), region = 52 }
  0x12   : > { %s3812_s9 = scalar_lea.vmem (!%p311_p9), %s3795_s17, %s3115_s13 }
  0x16   : > { %v337_v1 = vld [vmem:[%s4847_s1 + $0x8] sm:$0xff]  ;;  %v336_v2 = vld [vmem:[%s4847_s1] sm:$0xff]  ;;  %vm345_vm1 = vcmask 130048   ;;  %v326_v4 = vld [vmem:[%s3812_s9 + $0x50] sm:$0xff] }
  0x17   : > { %3402 = vmatprep.subr.mxu0 %v337_v1  ;;  %3608 = vmatprep.subr.mxu1 %v337_v1  ;;  %v316_v3 = vld [vmem:[%s3812_s9] sm:$0xff]  ;;  %v317_v5 = vld [vmem:[%s3812_s9 + $0x8] sm:$0xff]  ;;  %v327_v6 = vld [vmem:[%s3812_s9 + $0x58] sm:$0xff] }
  0x18   : > { %3403 = vmatpush3.msra.mxu0 %v337_v1  ;;  %3610 = vmatpush3.msra.mxu1 %v337_v1  ;;  %v318_v7 = vld [vmem:[%s3812_s9 + $0x10] sm:$0xff]  ;;  %v328_v8 = vld [vmem:[%s3812_s9 + $0x60] sm:$0xff]  ;;  %v319_v9 = vld [vmem:[%s3812_s9 + $0x18] sm:$0xff] }
  0x19   : > { %3404 = vmatprep.subr.mxu0 %v336_v2  ;;  %3609 = vmatprep.subr.mxu1 %v336_v2  ;;  %v329_v10 = vld [vmem:[%s3812_s9 + $0x68] sm:$0xff]  ;;  %v320_v11 = vld [vmem:[%s3812_s9 + $0x20] sm:$0xff]  ;;  %v330_v12 = vld [vmem:[%s3812_s9 + $0x70] sm:$0xff] }
  0x1a   : > { %3405 = vmatpush3.msra.mxu0 %v336_v2  ;;  %3611 = vmatpush3.msra.mxu1 %v336_v2  ;;  %v321_v13 = vld [vmem:[%s3812_s9 + $0x28] sm:$0xff]  ;;  %v331_v14 = vld [vmem:[%s3812_s9 + $0x78] sm:$0xff]  ;;  %v322_v15 = vld [vmem:[%s3812_s9 + $0x30] sm:$0xff] }
  0x1b   : > { %3406 = vmatprep.mubr.msk.f32.mxu0 %vm345_vm1, %v316_v3  ;;  %3421 = vmatprep.mubr.msk.f32.mxu1 %vm345_vm1, %v326_v4  ;;  %v332_v16 = vld [vmem:[%s3812_s9 + $0x80] sm:$0xff]  ;;  %v323_v17 = vld [vmem:[%s3812_s9 + $0x38] sm:$0xff]  ;;  %v333_v18 = vld [vmem:[%s3812_s9 + $0x88] sm:$0xff] }
  0x1c   : > { %3407 = vmatmul.mubr.msk.f32.vlgmr.msra.gmra.mxu0 %vm345_vm1, %v317_v5  ;;  %3422 = vmatmul.mubr.msk.f32.vlgmr.msra.gmra.mxu1 %vm345_vm1, %v327_v6  ;;  %v324_v19 = vld [vmem:[%s3812_s9 + $0x40] sm:$0xff]  ;;  %v334_v20 = vld [vmem:[%s3812_s9 + $0x90] sm:$0xff]  ;;  %v325_v21 = vld [vmem:[%s3812_s9 + $0x48] sm:$0xff] }
  0x1d   : > { %3409 = vmatprep.mubr.msk.f32.mxu0 %vm345_vm1, %v318_v7  ;;  %3424 = vmatprep.mubr.msk.f32.mxu1 %vm345_vm1, %v328_v8  ;;  %v335_v22 = vld [vmem:[%s3812_s9 + $0x98] sm:$0xff]  ;;  %v3857_v23 = vld [vmem:[%s4850_s4] ss:$0 sm:$0xff] }
  0x20   : > { %3410 = vmatmul.mubr.msk.f32.gmra.mxu0 %vm345_vm1, %v319_v9  ;;  %3425 = vmatmul.mubr.msk.f32.gmra.mxu1 %vm345_vm1, %v329_v10 }
  0x21   : > { %3412 = vmatprep.mubr.msk.f32.mxu0 %vm345_vm1, %v320_v11  ;;  %3427 = vmatprep.mubr.msk.f32.mxu1 %vm345_vm1, %v330_v12 }
  0x24   : > { %3413 = vmatmul.mubr.msk.f32.gmra.mxu0 %vm345_vm1, %v321_v13  ;;  %3428 = vmatmul.mubr.msk.f32.gmra.mxu1 %vm345_vm1, %v331_v14 }
  0x25   : > { %3415 = vmatprep.mubr.msk.f32.mxu0 %vm345_vm1, %v322_v15  ;;  %3430 = vmatprep.mubr.msk.f32.mxu1 %vm345_vm1, %v332_v16 }
  0x28   : > { %3416 = vmatmul.mubr.msk.f32.gmra.mxu0 %vm345_vm1, %v323_v17  ;;  %3431 = vmatmul.mubr.msk.f32.gmra.mxu1 %vm345_vm1, %v333_v18 }
  0x29   : > { %3418 = vmatprep.mubr.msk.f32.mxu0 %vm345_vm1, %v324_v19  ;;  %3433 = vmatprep.mubr.msk.f32.mxu1 %vm345_vm1, %v334_v20 }
  0x2c   : > { %3419 = vmatmul.mubr.msk.f32.gmra.mxu0 %vm345_vm1, %v325_v21  ;;  %3434 = vmatmul.mubr.msk.f32.gmra.mxu1 %vm345_vm1, %v335_v22 }
  0xdc   : > { %v3408_v24 = vpop.f32.mrf.mxu0  ;;  %v3423_v25 = vpop.f32.mrf.mxu1 }
  0xdd   : > { %v478_v26 = vadd.f32 %v3408_v24, %v3857_v23  ;;  %v528_v27 = vadd.f32 %v3423_v25, %v3857_v23 }
  0xde   : > { %v472_v28 = vpop.f32.mrf.mxu0  ;;  %v522_v29 = vpop.f32.mrf.mxu1 }
  0xdf   : > { %v572_v30 = vmax.f32 %v478_v26, 0.0  ;;  %v582_v31 = vmax.f32 %v528_v27, 0.0  ;;  %v473_v32 = vadd.f32 %v3857_v23, %v472_v28  ;;  %v523_v33 = vadd.f32 %v3857_v23, %v522_v29 }
  0xe0   : > { %v3411_v34 = vpop.f32.mrf.mxu0  ;;  %v3426_v35 = vpop.f32.mrf.mxu1 }
  0xe1   : > { %592 = vst.msk [vmem:[#allocation2 + $0x10] sm:$0xff] %vm306_vm0, %v572_v30  ;;  %602 = vst.msk [vmem:[#allocation2 + $0x60] sm:$0xff] %vm306_vm0, %v582_v31  ;;  %v571_v36 = vmax.f32 %v473_v32, 0.0  ;;  %v581_v37 = vmax.f32 %v523_v33, 0.0  ;;  %v488_v38 = vadd.f32 %v3411_v34, %v3857_v23  ;;  %v538_v39 = vadd.f32 %v3426_v35, %v3857_v23 }
  0xe2   : > { %v482_v40 = vpop.f32.mrf.mxu0  ;;  %v532_v41 = vpop.f32.mrf.mxu1 }
  0xe3   : > { %591 = vst.msk [vmem:[#allocation2 + $0x8] sm:$0xff] %vm306_vm0, %v571_v36  ;;  %601 = vst.msk [vmem:[#allocation2 + $0x58] sm:$0xff] %vm306_vm0, %v581_v37  ;;  %v574_v42 = vmax.f32 %v488_v38, 0.0  ;;  %v584_v43 = vmax.f32 %v538_v39, 0.0  ;;  %v483_v44 = vadd.f32 %v3857_v23, %v482_v40  ;;  %v533_v45 = vadd.f32 %v3857_v23, %v532_v41 }
  0xe4   : > { %v3414_v46 = vpop.f32.mrf.mxu0  ;;  %v3429_v47 = vpop.f32.mrf.mxu1 }
  0xe5   : > { %594 = vst.msk [vmem:[#allocation2 + $0x20] sm:$0xff] %vm306_vm0, %v574_v42  ;;  %604 = vst.msk [vmem:[#allocation2 + $0x70] sm:$0xff] %vm306_vm0, %v584_v43  ;;  %v573_v48 = vmax.f32 %v483_v44, 0.0  ;;  %v583_v49 = vmax.f32 %v533_v45, 0.0  ;;  %v498_v50 = vadd.f32 %v3414_v46, %v3857_v23  ;;  %v548_v51 = vadd.f32 %v3429_v47, %v3857_v23 }
  0xe6   : > { %v492_v52 = vpop.f32.mrf.mxu0  ;;  %v542_v53 = vpop.f32.mrf.mxu1 }
  0xe7   : > { %593 = vst.msk [vmem:[#allocation2 + $0x18] sm:$0xff] %vm306_vm0, %v573_v48  ;;  %603 = vst.msk [vmem:[#allocation2 + $0x68] sm:$0xff] %vm306_vm0, %v583_v49  ;;  %v576_v54 = vmax.f32 %v498_v50, 0.0  ;;  %v586_v55 = vmax.f32 %v548_v51, 0.0  ;;  %v493_v56 = vadd.f32 %v3857_v23, %v492_v52  ;;  %v543_v57 = vadd.f32 %v3857_v23, %v542_v53 }
  0xe8   : > { %v3417_v58 = vpop.f32.mrf.mxu0  ;;  %v3432_v59 = vpop.f32.mrf.mxu1 }
  0xe9   : > { %596 = vst.msk [vmem:[#allocation2 + $0x30] sm:$0xff] %vm306_vm0, %v576_v54  ;;  %606 = vst.msk [vmem:[#allocation2 + $0x80] sm:$0xff] %vm306_vm0, %v586_v55  ;;  %v575_v60 = vmax.f32 %v493_v56, 0.0  ;;  %v585_v61 = vmax.f32 %v543_v57, 0.0  ;;  %v508_v62 = vadd.f32 %v3417_v58, %v3857_v23  ;;  %v558_v63 = vadd.f32 %v3432_v59, %v3857_v23 }
  0xea   : > { %v502_v1 = vpop.f32.mrf.mxu0  ;;  %v552_v2 = vpop.f32.mrf.mxu1 }
  0xeb   : > { %595 = vst.msk [vmem:[#allocation2 + $0x28] sm:$0xff] %vm306_vm0, %v575_v60  ;;  %605 = vst.msk [vmem:[#allocation2 + $0x78] sm:$0xff] %vm306_vm0, %v585_v61  ;;  %v578_v3 = vmax.f32 %v508_v62, 0.0  ;;  %v588_v4 = vmax.f32 %v558_v63, 0.0  ;;  %v503_v5 = vadd.f32 %v3857_v23, %v502_v1  ;;  %v553_v6 = vadd.f32 %v3857_v23, %v552_v2 }
  0xec   : > { %v3420_v7 = vpop.f32.mrf.mxu0  ;;  %v3435_v8 = vpop.f32.mrf.mxu1 }
  0xed   : > { %598 = vst.msk [vmem:[#allocation2 + $0x40] sm:$0xff] %vm306_vm0, %v578_v3  ;;  %608 = vst.msk [vmem:[#allocation2 + $0x90] sm:$0xff] %vm306_vm0, %v588_v4  ;;  %v577_v9 = vmax.f32 %v503_v5, 0.0  ;;  %v587_v10 = vmax.f32 %v553_v6, 0.0  ;;  %v518_v11 = vadd.f32 %v3420_v7, %v3857_v23  ;;  %v568_v12 = vadd.f32 %v3435_v8, %v3857_v23 }
  0xee   : > { %v512_v13 = vpop.f32.mrf.mxu0  ;;  %v562_v14 = vpop.f32.mrf.mxu1 }
  0xef   : > { %597 = vst.msk [vmem:[#allocation2 + $0x38] sm:$0xff] %vm306_vm0, %v577_v9  ;;  %607 = vst.msk [vmem:[#allocation2 + $0x88] sm:$0xff] %vm306_vm0, %v587_v10  ;;  %v580_v15 = vmax.f32 %v518_v11, 0.0  ;;  %v590_v16 = vmax.f32 %v568_v12, 0.0  ;;  %v513_v17 = vadd.f32 %v3857_v23, %v512_v13  ;;  %v563_v18 = vadd.f32 %v3857_v23, %v562_v14 }
  0xf1   : > { %600 = vst.msk [vmem:[#allocation2 + $0x50] sm:$0xff] %vm306_vm0, %v580_v15  ;;  %610 = vst.msk [vmem:[#allocation2 + $0xa0] sm:$0xff] %vm306_vm0, %v590_v16  ;;  %v579_v19 = vmax.f32 %v513_v17, 0.0  ;;  %v589_v20 = vmax.f32 %v563_v18, 0.0 }
  0xf3   : > { %599 = vst.msk [vmem:[#allocation2 + $0x48] sm:$0xff] %vm306_vm0, %v579_v19  ;;  %609 = vst.msk [vmem:[#allocation2 + $0x98] sm:$0xff] %vm306_vm0, %v589_v20 }
  0xf4 PF: > { %p3137_p10 = scmp.ne.s32.totalorder %s3687_s24, 0 }
  0xf5   : > { %s3908_s19 = scalar_lea.vmem (!%p3137_p10), %s3795_s17, %s3788_s12 }
  0xf6   : > { %614 = sbr.rel (%p3137_p10) target bundleno = 472 (0x1d8), region = 56 }
  0xfb   : > { %v637_v21 = vld [vmem:[%s4847_s1 + $0x8] sm:$0xff]  ;;  %v636_v22 = vld [vmem:[%s4847_s1] sm:$0xff]  ;;  %vm645_vm2 = vcmask 130048   ;;  %v3706_v23 = vmov 0.0   ;;  %v628_v26 = vld [vmem:[%s3908_s19 + $0x50] sm:$0xff] }
  0xfc   : > { %615 = vst.msk [vmem:[#allocation2 + $0x8] sm:$0xff] %vm306_vm0, %v3706_v23  ;;  %616 = vst.msk [vmem:[#allocation2 + $0x10] sm:$0xff] %vm306_vm0, %v3706_v23  ;;  %3436 = vmatprep.subr.mxu0 %v637_v21  ;;  %3612 = vmatprep.subr.mxu1 %v637_v21  ;;  %v618_v24 = vld [vmem:[%s3908_s19] sm:$0xff]  ;;  %v619_v25 = vld [vmem:[%s3908_s19 + $0x8] sm:$0xff] }
  0xfd   : > { %3437 = vmatpush3.msra.mxu0 %v637_v21  ;;  %3614 = vmatpush3.msra.mxu1 %v637_v21  ;;  %v620_v27 = vld [vmem:[%s3908_s19 + $0x10] sm:$0xff]  ;;  %v629_v28 = vld [vmem:[%s3908_s19 + $0x58] sm:$0xff]  ;;  %v630_v29 = vld [vmem:[%s3908_s19 + $0x60] sm:$0xff] }
  0xfe   : > { %3438 = vmatprep.subr.mxu0 %v636_v22  ;;  %3440 = vmatprep.mubr.msk.f32.mxu0 %vm645_vm2, %v618_v24  ;;  %v621_v30 = vld [vmem:[%s3908_s19 + $0x18] sm:$0xff]  ;;  %v622_v31 = vld [vmem:[%s3908_s19 + $0x20] sm:$0xff]  ;;  %v631_v32 = vld [vmem:[%s3908_s19 + $0x68] sm:$0xff] }
  0xff   : > { %3439 = vmatpush3.msra.mxu0 %v636_v22  ;;  %3613 = vmatprep.subr.mxu1 %v636_v22  ;;  %v632_v33 = vld [vmem:[%s3908_s19 + $0x70] sm:$0xff]  ;;  %v623_v34 = vld [vmem:[%s3908_s19 + $0x28] sm:$0xff]  ;;  %v633_v36 = vld [vmem:[%s3908_s19 + $0x78] sm:$0xff] }
 0x100   : > { %3441 = vmatmul.mubr.msk.f32.vlgmr.msra.gmra.mxu0 %vm645_vm2, %v619_v25  ;;  %3615 = vmatpush3.msra.mxu1 %v636_v22  ;;  %v624_v35 = vld [vmem:[%s3908_s19 + $0x30] sm:$0xff]  ;;  %v634_v37 = vld [vmem:[%s3908_s19 + $0x80] sm:$0xff]  ;;  %v625_v38 = vld [vmem:[%s3908_s19 + $0x38] sm:$0xff] }
 0x101   : > { %3455 = vmatprep.mubr.msk.f32.mxu1 %vm645_vm2, %v628_v26  ;;  %3443 = vmatprep.mubr.msk.f32.mxu0 %vm645_vm2, %v620_v27  ;;  %v626_v39 = vld [vmem:[%s3908_s19 + $0x40] sm:$0xff]  ;;  %v635_v40 = vld [vmem:[%s3908_s19 + $0x88] sm:$0xff] }
 0x102   : > { %3456 = vmatmul.mubr.msk.f32.vlgmr.msra.gmra.mxu1 %vm645_vm2, %v629_v28  ;;  %v627_v41 = vld [vmem:[%s3908_s19 + $0x48] sm:$0xff]  ;;  %v3951_v42 = vld [vmem:[%s4850_s4] ss:$0 sm:$0xff] }
 0x103   : > { %3458 = vmatprep.mubr.msk.f32.mxu1 %vm645_vm2, %v630_v29 }
 0x104   : > { %3444 = vmatmul.mubr.msk.f32.gmra.mxu0 %vm645_vm2, %v621_v30 }
 0x105   : > { %3446 = vmatprep.mubr.msk.f32.mxu0 %vm645_vm2, %v622_v31 }
 0x106   : > { %3459 = vmatmul.mubr.msk.f32.gmra.mxu1 %vm645_vm2, %v631_v32 }
 0x107   : > { %3461 = vmatprep.mubr.msk.f32.mxu1 %vm645_vm2, %v632_v33 }
 0x108   : > { %3447 = vmatmul.mubr.msk.f32.gmra.mxu0 %vm645_vm2, %v623_v34 }
 0x109   : > { %3449 = vmatprep.mubr.msk.f32.mxu0 %vm645_vm2, %v624_v35 }
 0x10a   : > { %3462 = vmatmul.mubr.msk.f32.gmra.mxu1 %vm645_vm2, %v633_v36 }
 0x10b   : > { %3464 = vmatprep.mubr.msk.f32.mxu1 %vm645_vm2, %v634_v37 }
 0x10c   : > { %3450 = vmatmul.mubr.msk.f32.gmra.mxu0 %vm645_vm2, %v625_v38 }
 0x10d   : > { %3452 = vmatprep.mubr.msk.f32.mxu0 %vm645_vm2, %v626_v39 }
 0x10e   : > { %3465 = vmatmul.mubr.msk.f32.gmra.mxu1 %vm645_vm2, %v635_v40 }
 0x110   : > { %3453 = vmatmul.mubr.msk.f32.gmra.mxu0 %vm645_vm2, %v627_v41 }
 0x1c0   : > { %v3442_v43 = vpop.f32.mrf.mxu0 }
 0x1c1   : > { %v772_v44 = vadd.f32 %v3442_v43, %v3951_v42 }
 0x1c2   : > { %v766_v45 = vpop.f32.mrf.mxu0  ;;  %v3457_v46 = vpop.f32.mrf.mxu1 }
 0x1c3   : > { %v856_v47 = vmax.f32 %v772_v44, 0.0  ;;  %v767_v48 = vadd.f32 %v3951_v42, %v766_v45  ;;  %v822_v49 = vadd.f32 %v3457_v46, %v3951_v42 }
 0x1c4   : > { %v3445_v50 = vpop.f32.mrf.mxu0  ;;  %v816_v51 = vpop.f32.mrf.mxu1 }
 0x1c5   : > { %874 = vst.msk [vmem:[#allocation2 + $0x20] sm:$0xff] %vm306_vm0, %v856_v47  ;;  %v855_v52 = vmax.f32 %v767_v48, 0.0  ;;  %v866_v53 = vmax.f32 %v822_v49, 0.0  ;;  %v782_v54 = vadd.f32 %v3445_v50, %v3951_v42  ;;  %v817_v55 = vadd.f32 %v3951_v42, %v816_v51 }
 0x1c6   : > { %v776_v56 = vpop.f32.mrf.mxu0  ;;  %v3460_v57 = vpop.f32.mrf.mxu1 }
 0x1c7   : > { %873 = vst.msk [vmem:[#allocation2 + $0x18] sm:$0xff] %vm306_vm0, %v855_v52  ;;  %884 = vst.msk [vmem:[#allocation2 + $0x70] sm:$0xff] %vm306_vm0, %v866_v53  ;;  %v858_v58 = vmax.f32 %v782_v54, 0.0  ;;  %v865_v59 = vmax.f32 %v817_v55, 0.0  ;;  %v777_v60 = vadd.f32 %v3951_v42, %v776_v56  ;;  %v832_v61 = vadd.f32 %v3460_v57, %v3951_v42 }
 0x1c8   : > { %v3448_v62 = vpop.f32.mrf.mxu0  ;;  %v826_v63 = vpop.f32.mrf.mxu1 }
 0x1c9   : > { %876 = vst.msk [vmem:[#allocation2 + $0x30] sm:$0xff] %vm306_vm0, %v858_v58  ;;  %883 = vst.msk [vmem:[#allocation2 + $0x68] sm:$0xff] %vm306_vm0, %v865_v59  ;;  %v857_v1 = vmax.f32 %v777_v60, 0.0  ;;  %v868_v2 = vmax.f32 %v832_v61, 0.0  ;;  %v792_v3 = vadd.f32 %v3448_v62, %v3951_v42  ;;  %v827_v4 = vadd.f32 %v3951_v42, %v826_v63 }
 0x1ca   : > { %v786_v5 = vpop.f32.mrf.mxu0  ;;  %v3463_v6 = vpop.f32.mrf.mxu1 }
 0x1cb   : > { %875 = vst.msk [vmem:[#allocation2 + $0x28] sm:$0xff] %vm306_vm0, %v857_v1  ;;  %886 = vst.msk [vmem:[#allocation2 + $0x80] sm:$0xff] %vm306_vm0, %v868_v2  ;;  %v860_v7 = vmax.f32 %v792_v3, 0.0  ;;  %v867_v8 = vmax.f32 %v827_v4, 0.0  ;;  %v787_v9 = vadd.f32 %v3951_v42, %v786_v5  ;;  %v842_v10 = vadd.f32 %v3463_v6, %v3951_v42 }
 0x1cc   : > { %v3451_v11 = vpop.f32.mrf.mxu0  ;;  %v836_v12 = vpop.f32.mrf.mxu1 }
 0x1cd   : > { %878 = vst.msk [vmem:[#allocation2 + $0x40] sm:$0xff] %vm306_vm0, %v860_v7  ;;  %885 = vst.msk [vmem:[#allocation2 + $0x78] sm:$0xff] %vm306_vm0, %v867_v8  ;;  %v859_v13 = vmax.f32 %v787_v9, 0.0  ;;  %v870_v14 = vmax.f32 %v842_v10, 0.0  ;;  %v802_v15 = vadd.f32 %v3451_v11, %v3951_v42  ;;  %v837_v16 = vadd.f32 %v3951_v42, %v836_v12 }
 0x1ce   : > { %v796_v17 = vpop.f32.mrf.mxu0  ;;  %v3466_v18 = vpop.f32.mrf.mxu1 }
 0x1cf   : > { %877 = vst.msk [vmem:[#allocation2 + $0x38] sm:$0xff] %vm306_vm0, %v859_v13  ;;  %888 = vst.msk [vmem:[#allocation2 + $0x90] sm:$0xff] %vm306_vm0, %v870_v14  ;;  %v862_v19 = vmax.f32 %v802_v15, 0.0  ;;  %v869_v20 = vmax.f32 %v837_v16, 0.0  ;;  %v797_v21 = vadd.f32 %v3951_v42, %v796_v17  ;;  %v852_v22 = vadd.f32 %v3466_v18, %v3951_v42 }
 0x1d0   : > { %v3454_v23 = vpop.f32.mrf.mxu0  ;;  %v846_v24 = vpop.f32.mrf.mxu1 }
 0x1d1   : > { %880 = vst.msk [vmem:[#allocation2 + $0x50] sm:$0xff] %vm306_vm0, %v862_v19  ;;  %887 = vst.msk [vmem:[#allocation2 + $0x88] sm:$0xff] %vm306_vm0, %v869_v20  ;;  %v861_v25 = vmax.f32 %v797_v21, 0.0  ;;  %v872_v26 = vmax.f32 %v852_v22, 0.0  ;;  %v812_v27 = vadd.f32 %v3454_v23, %v3951_v42  ;;  %v847_v28 = vadd.f32 %v3951_v42, %v846_v24 }
 0x1d2   : > { %v806_v29 = vpop.f32.mrf.mxu0 }
 0x1d3   : > { %879 = vst.msk [vmem:[#allocation2 + $0x48] sm:$0xff] %vm306_vm0, %v861_v25  ;;  %890 = vst.msk [vmem:[#allocation2 + $0xa0] sm:$0xff] %vm306_vm0, %v872_v26  ;;  %v864_v30 = vmax.f32 %v812_v27, 0.0  ;;  %v871_v31 = vmax.f32 %v847_v28, 0.0  ;;  %v807_v32 = vadd.f32 %v3951_v42, %v806_v29 }
 0x1d5   : > { %882 = vst.msk [vmem:[#allocation2 + $0x60] sm:$0xff] %vm306_vm0, %v864_v30  ;;  %889 = vst.msk [vmem:[#allocation2 + $0x98] sm:$0xff] %vm306_vm0, %v871_v31  ;;  %v863_v33 = vmax.f32 %v807_v32, 0.0 }
 0x1d7   : > { %881 = vst.msk [vmem:[#allocation2 + $0x58] sm:$0xff] %vm306_vm0, %v863_v33 }
 0x1d8 PF: > { %p3157_p11 = scmp.ne.s32.totalorder %s3687_s24, 1 }
 0x1d9   : > { %s3999_s10 = scalar_lea.vmem (!%p3157_p11), %s3795_s17, %s3115_s13 }
 0x1da   : > { %894 = sbr.rel (%p3157_p11) target bundleno = 700 (0x2bc), region = 60 }
 0x1df   : > { %v917_v34 = vld [vmem:[%s4847_s1 + $0x8] sm:$0xff]  ;;  %v916_v35 = vld [vmem:[%s4847_s1] sm:$0xff]  ;;  %vm925_vm3 = vcmask 130048   ;;  %v3707_v36 = vmov 0.0   ;;  %v908_v39 = vld [vmem:[%s3999_s10 + $0x50] sm:$0xff] }
 0x1e0   : > { %895 = vst.msk [vmem:[#allocation2 + $0x98] sm:$0xff] %vm306_vm0, %v3707_v36  ;;  %896 = vst.msk [vmem:[#allocation2 + $0xa0] sm:$0xff] %vm306_vm0, %v3707_v36  ;;  %3467 = vmatprep.subr.mxu0 %v917_v34  ;;  %3616 = vmatprep.subr.mxu1 %v917_v34  ;;  %v898_v37 = vld [vmem:[%s3999_s10] sm:$0xff]  ;;  %v899_v38 = vld [vmem:[%s3999_s10 + $0x8] sm:$0xff] }
 0x1e1   : > { %3468 = vmatpush3.msra.mxu0 %v917_v34  ;;  %3618 = vmatpush3.msra.mxu1 %v917_v34  ;;  %v900_v40 = vld [vmem:[%s3999_s10 + $0x10] sm:$0xff]  ;;  %v909_v41 = vld [vmem:[%s3999_s10 + $0x58] sm:$0xff]  ;;  %v910_v42 = vld [vmem:[%s3999_s10 + $0x60] sm:$0xff] }
 0x1e2   : > { %3469 = vmatprep.subr.mxu0 %v916_v35  ;;  %3471 = vmatprep.mubr.msk.f32.mxu0 %vm925_vm3, %v898_v37  ;;  %v901_v43 = vld [vmem:[%s3999_s10 + $0x18] sm:$0xff]  ;;  %v902_v44 = vld [vmem:[%s3999_s10 + $0x20] sm:$0xff]  ;;  %v911_v45 = vld [vmem:[%s3999_s10 + $0x68] sm:$0xff] }
 0x1e3   : > { %3470 = vmatpush3.msra.mxu0 %v916_v35  ;;  %3617 = vmatprep.subr.mxu1 %v916_v35  ;;  %v912_v46 = vld [vmem:[%s3999_s10 + $0x70] sm:$0xff]  ;;  %v903_v47 = vld [vmem:[%s3999_s10 + $0x28] sm:$0xff]  ;;  %v913_v49 = vld [vmem:[%s3999_s10 + $0x78] sm:$0xff] }
 0x1e4   : > { %3472 = vmatmul.mubr.msk.f32.vlgmr.msra.gmra.mxu0 %vm925_vm3, %v899_v38  ;;  %3619 = vmatpush3.msra.mxu1 %v916_v35  ;;  %v904_v48 = vld [vmem:[%s3999_s10 + $0x30] sm:$0xff]  ;;  %v914_v50 = vld [vmem:[%s3999_s10 + $0x80] sm:$0xff]  ;;  %v905_v51 = vld [vmem:[%s3999_s10 + $0x38] sm:$0xff] }
 0x1e5   : > { %3486 = vmatprep.mubr.msk.f32.mxu1 %vm925_vm3, %v908_v39  ;;  %3474 = vmatprep.mubr.msk.f32.mxu0 %vm925_vm3, %v900_v40  ;;  %v906_v52 = vld [vmem:[%s3999_s10 + $0x40] sm:$0xff]  ;;  %v915_v53 = vld [vmem:[%s3999_s10 + $0x88] sm:$0xff] }
 0x1e6   : > { %3487 = vmatmul.mubr.msk.f32.vlgmr.msra.gmra.mxu1 %vm925_vm3, %v909_v41  ;;  %v907_v54 = vld [vmem:[%s3999_s10 + $0x48] sm:$0xff]  ;;  %v4042_v55 = vld [vmem:[%s4850_s4] ss:$0 sm:$0xff] }
 0x1e7   : > { %3489 = vmatprep.mubr.msk.f32.mxu1 %vm925_vm3, %v910_v42 }
 0x1e8   : > { %3475 = vmatmul.mubr.msk.f32.gmra.mxu0 %vm925_vm3, %v901_v43 }
 0x1e9   : > { %3477 = vmatprep.mubr.msk.f32.mxu0 %vm925_vm3, %v902_v44 }
 0x1ea   : > { %3490 = vmatmul.mubr.msk.f32.gmra.mxu1 %vm925_vm3, %v911_v45 }
 0x1eb   : > { %3492 = vmatprep.mubr.msk.f32.mxu1 %vm925_vm3, %v912_v46 }
 0x1ec   : > { %3478 = vmatmul.mubr.msk.f32.gmra.mxu0 %vm925_vm3, %v903_v47 }
 0x1ed   : > { %3480 = vmatprep.mubr.msk.f32.mxu0 %vm925_vm3, %v904_v48 }
 0x1ee   : > { %3493 = vmatmul.mubr.msk.f32.gmra.mxu1 %vm925_vm3, %v913_v49 }
 0x1ef   : > { %3495 = vmatprep.mubr.msk.f32.mxu1 %vm925_vm3, %v914_v50 }
 0x1f0   : > { %3481 = vmatmul.mubr.msk.f32.gmra.mxu0 %vm925_vm3, %v905_v51 }
 0x1f1   : > { %3483 = vmatprep.mubr.msk.f32.mxu0 %vm925_vm3, %v906_v52 }
 0x1f2   : > { %3496 = vmatmul.mubr.msk.f32.gmra.mxu1 %vm925_vm3, %v915_v53 }
 0x1f4   : > { %3484 = vmatmul.mubr.msk.f32.gmra.mxu0 %vm925_vm3, %v907_v54 }
 0x2a4   : > { %v3473_v56 = vpop.f32.mrf.mxu0 }
 0x2a5   : > { %v1052_v57 = vadd.f32 %v3473_v56, %v4042_v55 }
 0x2a6   : > { %v1046_v58 = vpop.f32.mrf.mxu0  ;;  %v3488_v59 = vpop.f32.mrf.mxu1 }
 0x2a7   : > { %v1136_v60 = vmax.f32 %v1052_v57, 0.0  ;;  %v1047_v61 = vadd.f32 %v4042_v55, %v1046_v58  ;;  %v1102_v62 = vadd.f32 %v3488_v59, %v4042_v55 }
 0x2a8   : > { %v3476_v63 = vpop.f32.mrf.mxu0  ;;  %v1096_v1 = vpop.f32.mrf.mxu1 }
 0x2a9   : > { %1154 = vst.msk [vmem:[#allocation2 + $0x10] sm:$0xff] %vm306_vm0, %v1136_v60  ;;  %v1135_v2 = vmax.f32 %v1047_v61, 0.0  ;;  %v1146_v3 = vmax.f32 %v1102_v62, 0.0  ;;  %v1062_v4 = vadd.f32 %v3476_v63, %v4042_v55  ;;  %v1097_v5 = vadd.f32 %v4042_v55, %v1096_v1 }
 0x2aa   : > { %v1056_v6 = vpop.f32.mrf.mxu0  ;;  %v3491_v7 = vpop.f32.mrf.mxu1 }
 0x2ab   : > { %1153 = vst.msk [vmem:[#allocation2 + $0x8] sm:$0xff] %vm306_vm0, %v1135_v2  ;;  %1164 = vst.msk [vmem:[#allocation2 + $0x60] sm:$0xff] %vm306_vm0, %v1146_v3  ;;  %v1138_v8 = vmax.f32 %v1062_v4, 0.0  ;;  %v1145_v9 = vmax.f32 %v1097_v5, 0.0  ;;  %v1057_v10 = vadd.f32 %v4042_v55, %v1056_v6  ;;  %v1112_v11 = vadd.f32 %v3491_v7, %v4042_v55 }
 0x2ac   : > { %v3479_v12 = vpop.f32.mrf.mxu0  ;;  %v1106_v13 = vpop.f32.mrf.mxu1 }
 0x2ad   : > { %1156 = vst.msk [vmem:[#allocation2 + $0x20] sm:$0xff] %vm306_vm0, %v1138_v8  ;;  %1163 = vst.msk [vmem:[#allocation2 + $0x58] sm:$0xff] %vm306_vm0, %v1145_v9  ;;  %v1137_v14 = vmax.f32 %v1057_v10, 0.0  ;;  %v1148_v15 = vmax.f32 %v1112_v11, 0.0  ;;  %v1072_v16 = vadd.f32 %v3479_v12, %v4042_v55  ;;  %v1107_v17 = vadd.f32 %v4042_v55, %v1106_v13 }
 0x2ae   : > { %v1066_v18 = vpop.f32.mrf.mxu0  ;;  %v3494_v19 = vpop.f32.mrf.mxu1 }
 0x2af   : > { %1155 = vst.msk [vmem:[#allocation2 + $0x18] sm:$0xff] %vm306_vm0, %v1137_v14  ;;  %1166 = vst.msk [vmem:[#allocation2 + $0x70] sm:$0xff] %vm306_vm0, %v1148_v15  ;;  %v1140_v20 = vmax.f32 %v1072_v16, 0.0  ;;  %v1147_v21 = vmax.f32 %v1107_v17, 0.0  ;;  %v1067_v22 = vadd.f32 %v4042_v55, %v1066_v18  ;;  %v1122_v23 = vadd.f32 %v3494_v19, %v4042_v55 }
 0x2b0   : > { %v3482_v24 = vpop.f32.mrf.mxu0  ;;  %v1116_v25 = vpop.f32.mrf.mxu1 }
 0x2b1   : > { %1158 = vst.msk [vmem:[#allocation2 + $0x30] sm:$0xff] %vm306_vm0, %v1140_v20  ;;  %1165 = vst.msk [vmem:[#allocation2 + $0x68] sm:$0xff] %vm306_vm0, %v1147_v21  ;;  %v1139_v26 = vmax.f32 %v1067_v22, 0.0  ;;  %v1150_v27 = vmax.f32 %v1122_v23, 0.0  ;;  %v1082_v28 = vadd.f32 %v3482_v24, %v4042_v55  ;;  %v1117_v29 = vadd.f32 %v4042_v55, %v1116_v25 }
 0x2b2   : > { %v1076_v30 = vpop.f32.mrf.mxu0  ;;  %v3497_v31 = vpop.f32.mrf.mxu1 }
 0x2b3   : > { %1157 = vst.msk [vmem:[#allocation2 + $0x28] sm:$0xff] %vm306_vm0, %v1139_v26  ;;  %1168 = vst.msk [vmem:[#allocation2 + $0x80] sm:$0xff] %vm306_vm0, %v1150_v27  ;;  %v1142_v32 = vmax.f32 %v1082_v28, 0.0  ;;  %v1149_v33 = vmax.f32 %v1117_v29, 0.0  ;;  %v1077_v34 = vadd.f32 %v4042_v55, %v1076_v30  ;;  %v1132_v35 = vadd.f32 %v3497_v31, %v4042_v55 }
 0x2b4   : > { %v3485_v36 = vpop.f32.mrf.mxu0  ;;  %v1126_v37 = vpop.f32.mrf.mxu1 }
 0x2b5   : > { %1160 = vst.msk [vmem:[#allocation2 + $0x40] sm:$0xff] %vm306_vm0, %v1142_v32  ;;  %1167 = vst.msk [vmem:[#allocation2 + $0x78] sm:$0xff] %vm306_vm0, %v1149_v33  ;;  %v1141_v38 = vmax.f32 %v1077_v34, 0.0  ;;  %v1152_v39 = vmax.f32 %v1132_v35, 0.0  ;;  %v1092_v40 = vadd.f32 %v3485_v36, %v4042_v55  ;;  %v1127_v41 = vadd.f32 %v4042_v55, %v1126_v37 }
 0x2b6   : > { %v1086_v42 = vpop.f32.mrf.mxu0 }
 0x2b7   : > { %1159 = vst.msk [vmem:[#allocation2 + $0x38] sm:$0xff] %vm306_vm0, %v1141_v38  ;;  %1170 = vst.msk [vmem:[#allocation2 + $0x90] sm:$0xff] %vm306_vm0, %v1152_v39  ;;  %v1144_v43 = vmax.f32 %v1092_v40, 0.0  ;;  %v1151_v44 = vmax.f32 %v1127_v41, 0.0  ;;  %v1087_v45 = vadd.f32 %v4042_v55, %v1086_v42 }
 0x2b9   : > { %1162 = vst.msk [vmem:[#allocation2 + $0x50] sm:$0xff] %vm306_vm0, %v1144_v43  ;;  %1169 = vst.msk [vmem:[#allocation2 + $0x88] sm:$0xff] %vm306_vm0, %v1151_v44  ;;  %v1143_v46 = vmax.f32 %v1087_v45, 0.0 }
 0x2bb   : > { %1161 = vst.msk [vmem:[#allocation2 + $0x48] sm:$0xff] %vm306_vm0, %v1143_v46 }
 0x2bc PF: > { %v1510_v47 = vld [vmem:[#allocation2 + $0x18] sm:$0xff]  ;;  %v1171_v49 = vlaneseq  ;;  %s3708_s11 = smov 4   ;;  %s3709_s14 = smov 8   ;;  %v1511_v50 = vld [vmem:[#allocation2 + $0x20] sm:$0xff]  ;;  %v4085_v51 = vld [vmem:[#allocation2 + $0x30] sm:$0xff]  ;;  %vm1913_vm8 = vcmask 1043456  }
 0x2bd   : > { %v4080_v48 = vld [vmem:[#allocation2 + $0x19] sm:$0xff]  ;;  %1576 = vrot.lane.b32.xlu0 %v1510_v47, %s3708_s11  ;;  %v4098_v59 = vld [vmem:[#allocation2 + $0x28] sm:$0xff]  ;;  %v3193_v25 = vld [vmem:[%s4848_s2 + $0x10] sm:$0xff]  ;;  %vm1700_vm1 = vcmask 64512   ;;  %vm1864_vm2 = vcmask 97280   ;;  %s4760_s16 = scalar_lea.vmem %s3795_s17, %s3788_s12 }
 0x2be   : > { %1781 = vrot.lane.b32.xlu1 %v4080_v48, %s3709_s14  ;;  %v4087_v52 = vshrl.u32 %v1171_v49, 7  ;;  %v1527_v63 = vld [vmem:[#allocation2 + $0x21] sm:$0xff]  ;;  %v1529_v5 = vld [vmem:[#allocation2 + $0x31] sm:$0xff]  ;;  %v4107_v8 = vld [vmem:[#allocation2 + $0x29] sm:$0xff] }
 0x2bf   : > { %v3194_v18 = vld [vmem:[%s4848_s2 + $0x18] sm:$0xf]  ;;  %v1535_v26 = vld [vmem:[#allocation2 + $0x61] sm:$0xff] }
 0x2c0   : > { %v1173_v53 = vadd.s32 8, %v4087_v52  ;;  %v1175_v54 = vadd.s32 24, %v4087_v52  ;;  %v1177_v55 = vadd.s32 40, %v4087_v52  ;;  %v1179_v56 = vadd.s32 56, %v4087_v52  ;;  %v4130_v19 = vld [vmem:[#allocation2 + $0x38] sm:$0xff]  ;;  %3498 = vmatprep.subr.msk.mxu0 %vm1913_vm8, %v3194_v18  ;;  %v4156_v32 = vld [vmem:[#allocation2 + $0x40] sm:$0xff] }
 0x2c1   : > { %1578 = vrot.lane.b32.xlu0 %v1511_v50, %s3708_s11  ;;  %v1181_v57 = vadd.s32 72, %v4087_v52  ;;  %v1183_v58 = vadd.s32 88, %v4087_v52  ;;  %v1185_v9 = vadd.s32 104, %v4087_v52  ;;  %v1187_v17 = vadd.s32 120, %v4087_v52  ;;  %v1533_v20 = vld [vmem:[#allocation2 + $0x51] sm:$0xff]  ;;  %3499 = vmatpush3.msk.msra.mxu0 %vm1913_vm8, %v3194_v18  ;;  %v4163_v37 = vld [vmem:[#allocation2 + $0x39] sm:$0xff] }
 0x2c2   : > { %1582 = vrot.lane.b32.xlu1 %v4085_v51, %s3708_s11  ;;  %v1199_v60 = vand.u32 15, %v1173_v53  ;;  %v1213_v61 = vand.u32 15, %v1175_v54  ;;  %v1227_v62 = vand.u32 15, %v1177_v55  ;;  %v1241_v1 = vand.u32 15, %v1179_v56  ;;  %v1531_v12 = vld [vmem:[#allocation2 + $0x41] sm:$0xff]  ;;  %3500 = vmatprep.subr.mxu0 %v3193_v25  ;;  %v1537_v34 = vld [vmem:[#allocation2 + $0x71] sm:$0xff] }
 0x2c3   : > { %v1255_v2 = vand.u32 15, %v1181_v57  ;;  %v1269_v6 = vand.u32 15, %v1183_v58  ;;  %v1283_v21 = vand.u32 15, %v1185_v9  ;;  %v1174_v29 = vadd.s32 16, %v4087_v52  ;;  %3501 = vmatpush3.msra.mxu0 %v3193_v25  ;;  %v4165_v39 = vld [vmem:[#allocation2 + $0x17] sm:$0xff]  ;;  %v1539_v44 = vld [vmem:[#allocation2 + $0x81] sm:$0xff] }
 0x2c4   : > { %vm1429_vm4 = vcmp.ne.s32.totalorder %v1199_v60, 15  ;;  %vm1431_vm5 = vcmp.ne.s32.totalorder %v1213_v61, 15  ;;  %vm1433_vm6 = vcmp.ne.s32.totalorder %v1227_v62, 15  ;;  %vm1435_vm7 = vcmp.ne.s32.totalorder %v1241_v1, 15  ;;  %v4184_v50 = vld [vmem:[#allocation2 + $0x27] sm:$0xff]  ;;  %v1740_v55 = vld [vmem:[#allocation2 + $0x91] sm:$0xff] }
 0x2c5   : > { %1580 = vrot.lane.b32.xlu0 %v4098_v59, %s3708_s11  ;;  %v4103_v3 = vsel %vm1429_vm4, 1.0, %v3705_v0  ;;  %v3186_v4 = vsel %vm1431_vm5, 1.0, %v3705_v0  ;;  %v3187_v11 = vsel %vm1433_vm6, 1.0, %v3705_v0  ;;  %v3188_v14 = vsel %vm1435_vm7, 1.0, %v3705_v0  ;;  %v4188_v54 = vld [vmem:[#allocation2 + $0x48] sm:$0xff]  ;;  %v4204_v61 = vld [vmem:[#allocation2 + $0x50] sm:$0xff] }
 0x2c6   : > { %v1742_v7 = vmul.f32 %v4103_v3, %v1527_v63  ;;  %v1744_v10 = vmul.f32 %v3186_v4, %v1529_v5  ;;  %v4113_v13 = vmul.f32 %v4103_v3, %v1529_v5  ;;  %vm4118_vm9 = vcmp.ne.s32.totalorder %v1255_v2, 15  ;;  %v4231_v9 = vld [vmem:[#allocation2 + $0x68] sm:$0xff]  ;;  %v4249_v15 = vld [vmem:[#allocation2 + $0x80] sm:$0xff]  ;;  %v4267_v25 = vld [vmem:[#allocation2 + $0x90] sm:$0xff] }
 0x2c7   : > { %vm4122_vm10 = vcmp.ne.s32.totalorder %v1269_v6, 15  ;;  %v4132_v22 = vmul.f32 %v3186_v4, %v1527_v63  ;;  %v4134_v23 = vmul.f32 %v3186_v4, %v1531_v12  ;;  %v4136_v24 = vmul.f32 %v3187_v11, %v1529_v5  ;;  %v4209_v63 = vld [vmem:[#allocation2 + $0x49] sm:$0xff]  ;;  %v4218_v4 = vld [vmem:[#allocation2 + $0x58] sm:$0xff]  ;;  %v4223_v5 = vld [vmem:[#allocation2 + $0x60] sm:$0xff] }
 0x2c8   : > { %1783 = vrot.lane.b32.xlu1 %v1742_v7, %s3709_s14  ;;  %v4142_v27 = vmul.f32 %v3187_v11, %v1533_v20  ;;  %v4144_v28 = vmul.f32 %v3188_v14, %v1531_v12  ;;  %v3189_v30 = vsel %vm4118_vm9, 1.0, %v3705_v0  ;;  %v4152_v31 = vmul.f32 %v3188_v14, %v1535_v26  ;;  %v4225_v6 = vld [vmem:[#allocation2 + $0x59] sm:$0xff] }
 0x2c9   : > { %1785 = vrot.lane.b32.xlu0 %v4107_v8, %s3709_s14  ;;  %v3190_v33 = vsel %vm4122_vm10, 1.0, %v3705_v0  ;;  %v1206_v35 = vand.u32 15, %v1174_v29  ;;  %v4161_v36 = vmul.f32 %v3189_v30, %v1533_v20  ;;  %vm1441_vm11 = vcmp.ne.s32.totalorder %v1283_v21, 15  ;;  %v4251_v16 = vld [vmem:[#allocation2 + $0x79] sm:$0xff]  ;;  %v1718_v21 = vld [vmem:[%s4848_s2 + $0x8] sm:$0xf] }
 0x2ca   : > { %v1297_v38 = vand.u32 15, %v1187_v17  ;;  %v1176_v40 = vadd.s32 32, %v4087_v52  ;;  %v4168_v41 = vmul.f32 %v3189_v30, %v1537_v34  ;;  %v4170_v42 = vmul.f32 %v3190_v33, %v1535_v26  ;;  %3526 = vmatprep.subr.msk.mxu1 %vm1913_vm8, %v1718_v21  ;;  %v4273_v29 = vld [vmem:[#allocation2 + $0x89] sm:$0xff] }
 0x2cb   : > { %vm1382_vm12 = vcmp.ne.s32.totalorder %v1206_v35, 0  ;;  %v1746_v43 = vmul.f32 %v3187_v11, %v1531_v12  ;;  %v3191_v47 = vsel %vm1441_vm11, 1.0, %v3705_v0  ;;  %v4186_v53 = vmul.f32 %v3190_v33, %v1539_v44  ;;  %v4238_v11 = vld [vmem:[#allocation2 + $0x69] sm:$0xff]  ;;  %3527 = vmatpush3.msk.msra.mxu1 %vm1913_vm8, %v1718_v21 }
 0x2cc   : > { %1787 = vrot.lane.b32.xlu1 %v1744_v10, %s3709_s14  ;;  %v4175_v45 = vsel %vm1382_vm12, 1.0, %v3705_v0  ;;  %v1220_v46 = vand.u32 15, %v1176_v40  ;;  %vm1443_vm13 = vcmp.ne.s32.totalorder %v1297_v38, 15  ;;  %v4190_v56 = vmul.f32 %v3191_v47, %v1537_v34  ;;  %v4236_v10 = vld [vmem:[#allocation2 + $0x70] sm:$0xff]  ;;  %v4290_v38 = vld [vmem:[%s4848_s2 + $0x28] sm:$0xf] }
 0x2cd   : > { %1584 = vrot.lane.b32.xlu0 %v4130_v19, %s3708_s11  ;;  %v4182_v49 = vmul.f32 %v4175_v45, %v4165_v39  ;;  %v4195_v58 = vmul.f32 %v3191_v47, %v1740_v55  ;;  %v4207_v62 = vsel %vm1443_vm13, 1.0, %v3705_v0  ;;  %v1748_v2 = vmul.f32 %v3188_v14, %v1533_v20  ;;  %v4244_v14 = vld [vmem:[#allocation2 + $0x78] sm:$0xff]  ;;  %v4258_v20 = vld [vmem:[#allocation2 + $0x88] sm:$0xff]  ;;  %3554 = vmatprep.subr.msk.mxu0 %vm1913_vm8, %v4290_v38  ;;  %v1509_v40 = vld [vmem:[#allocation2 + $0x10] sm:$0xff] }
 0x2ce   : > { %vm1384_vm14 = vcmp.ne.s32.totalorder %v1220_v46, 0  ;;  %v4212_v1 = vmul.f32 %v4207_v62, %v1539_v44  ;;  %v1750_v7 = vmul.f32 %v3189_v30, %v1535_v26  ;;  %v1752_v12 = vmul.f32 %v3190_v33, %v1537_v34  ;;  %v1717_v26 = vld [vmem:[%s4848_s2] sm:$0xff]  ;;  %v1508_v34 = vld [vmem:[#allocation2 + $0x8] sm:$0xff] }
 0x2cf   : > { %v4193_v57 = vsel %vm1384_vm14, 1.0, %v3705_v0  ;;  %v1192_v17 = vand.u32 15, %v4087_v52  ;;  %v1754_v18 = vmul.f32 %v3191_v47, %v1539_v44  ;;  %3528 = vmatprep.subr.mxu1 %v1717_v26  ;;  %v1756_v35 = vmul.f32 %v4207_v62, %v1740_v55  ;;  %v1524_v44 = vld [vmem:[#allocation2 + $0x9] sm:$0xff]  ;;  %v4299_v47 = vld [vmem:[#allocation2 + $0x37] sm:$0xff] }
 0x2d0   : > { %1586 = vrot.lane.b32.xlu1 %v4156_v32, %s3708_s11  ;;  %v4200_v60 = vmul.f32 %v4193_v57, %v4184_v50  ;;  %3529 = vmatpush3.msra.mxu1 %v1717_v26  ;;  %v4303_v55 = vmul.f32 %v4175_v45, %v4299_v47  ;;  %v4428_v26 = vld [vmem:[#allocation2 + $0x3f] sm:$0xff] }
 0x2d1   : > { %1789 = vrot.lane.b32.xlu0 %v4163_v37, %s3709_s14  ;;  %vm1380_vm15 = vcmp.ne.s32.totalorder %v1192_v17, 0 }
 0x2d2   : > { %v4276_v30 = vsel %vm1380_vm15, 1.0, %v3705_v0 }
 0x2d3   : > { %v4280_v33 = vmul.f32 %v4276_v30, %v4184_v50 }
 0x2d4   : > { %1791 = vrot.lane.b32.xlu1 %v1746_v43, %s3709_s14  ;;  %v1525_v43 = vld [vmem:[#allocation2 + $0x11] sm:$0xff] }
 0x2d5   : > { %1588 = vrot.lane.b32.xlu0 %v4188_v54, %s3708_s11  ;;  %v1541_v46 = vmul.f32 %v4103_v3, %v1525_v43  ;;  %v4316_v3 = vld [vmem:[#allocation2 + $0x47] sm:$0xff] }
 0x2d8   : > { %1590 = vrot.lane.b32.xlu1 %v4204_v61, %s3708_s11 }
 0x2d9   : > { %1793 = vrot.lane.b32.xlu0 %v4209_v63, %s3709_s14 }
 0x2dc   : > { %1795 = vrot.lane.b32.xlu1 %v1748_v2, %s3709_s14  ;;  %v4320_v2 = vmul.f32 %v4193_v57, %v4316_v3 }
 0x2dd   : > { %1592 = vrot.lane.b32.xlu0 %v4218_v4, %s3708_s11 }
 0x2e0   : > { %1594 = vrot.lane.b32.xlu1 %v4223_v5, %s3708_s11 }
 0x2e1   : > { %1797 = vrot.lane.b32.xlu0 %v4225_v6, %s3709_s14 }
 0x2e4   : > { %1799 = vrot.lane.b32.xlu1 %v1750_v7, %s3709_s14  ;;  %v3229_v7 = vld [vmem:[%s4848_s2 + $0x20] sm:$0xff] }
 0x2e5   : > { %1596 = vrot.lane.b32.xlu0 %v4231_v9, %s3708_s11 }
 0x2e8   : > { %1598 = vrot.lane.b32.xlu1 %v4236_v10, %s3708_s11 }
 0x2e9   : > { %1801 = vrot.lane.b32.xlu0 %v4238_v11, %s3709_s14 }
 0x2ec   : > { %1803 = vrot.lane.b32.xlu1 %v1752_v12, %s3709_s14 }
 0x2ed   : > { %1600 = vrot.lane.b32.xlu0 %v4244_v14, %s3708_s11 }
 0x2f0   : > { %1602 = vrot.lane.b32.xlu1 %v4249_v15, %s3708_s11 }
 0x2f1   : > { %1805 = vrot.lane.b32.xlu0 %v4251_v16, %s3709_s14 }
 0x2f4   : > { %1807 = vrot.lane.b32.xlu1 %v1754_v18, %s3709_s14 }
 0x2f5   : > { %1759 = vrot.lane.b32.xlu0 %v4258_v20, %s3708_s11 }
 0x2f8   : > { %1761 = vrot.lane.b32.xlu1 %v4267_v25, %s3708_s11 }
 0x2f9   : > { %1809 = vrot.lane.b32.xlu0 %v4273_v29, %s3709_s14 }
 0x2fc   : > { %1572 = vrot.lane.b32.xlu1 %v1508_v34, %s3708_s11 }
 0x2fd   : > { %1811 = vrot.lane.b32.xlu0 %v1756_v35, %s3709_s14 }
 0x300   : > { %1574 = vrot.lane.b32.xlu1 %v1509_v40, %s3708_s11 }
 0x301   : > { %1636 = vrot.lane.b32.xlu0 %v1524_v44, %s3709_s14 }
 0x304   : > { %1638 = vrot.lane.b32.xlu1 %v1541_v46, %s3709_s14 }
 0x305   : > { %2354 = vrot.lane.b32.xlu0 %v4098_v59, %s3708_s11 }
 0x308   : > { %2356 = vrot.lane.b32.xlu1 %v4085_v51, %s3708_s11  ;;  %v1178_v51 = vadd.s32 48, %v4087_v52 }
 0x309   : > { %2418 = vrot.lane.b32.xlu0 %v4107_v8, %s3709_s14 }
 0x30c   : > { %2420 = vrot.lane.b32.xlu1 %v4113_v13, %s3709_s14 }
 0x30d   : > { %1640 = vrot.lane.b32.xlu0 %v4080_v48, %s3709_s14  ;;  %v1721_v48 = vmul.f32 %v4276_v30, %v4165_v39 }
 0x310   : > { %1642 = vrot.lane.b32.xlu1 %v4132_v22, %s3709_s14 }
 0x311   : > { %2358 = vrot.lane.b32.xlu0 %v4130_v19, %s3708_s11 }
 0x314   : > { %2360 = vrot.lane.b32.xlu1 %v4156_v32, %s3708_s11  ;;  %v1479_v32 = vld [vmem:[#allocation2 + $0x1f] sm:$0xff] }
 0x315   : > { %2422 = vrot.lane.b32.xlu0 %v4163_v37, %s3709_s14 }
 0x318   : > { %2424 = vrot.lane.b32.xlu1 %v4134_v23, %s3709_s14  ;;  %v1234_v23 = vand.u32 15, %v1178_v51  ;;  %v4458_v51 = vld [vmem:[#allocation2 + $0x4f] sm:$0xff] }
 0x319   : > { %1644 = vrot.lane.b32.xlu0 %v4107_v8, %s3709_s14 }
 0x31a   : > { %vm1386_vm3 = vcmp.ne.s32.totalorder %v1234_v23, 0 }
 0x31c   : > { %1646 = vrot.lane.b32.xlu1 %v4136_v24, %s3709_s14 }
 0x31d   : > { %2362 = vrot.lane.b32.xlu0 %v4188_v54, %s3708_s11 }
 0x320   : > { %2364 = vrot.lane.b32.xlu1 %v4204_v61, %s3708_s11  ;;  %v4390_v61 = vld [vmem:[#allocation2 + $0x2f] sm:$0xff] }
 0x321   : > { %2426 = vrot.lane.b32.xlu0 %v4209_v63, %s3709_s14 }
 0x324   : > { %2428 = vrot.lane.b32.xlu1 %v4142_v27, %s3709_s14 }
 0x325   : > { %1648 = vrot.lane.b32.xlu0 %v4163_v37, %s3709_s14 }
 0x328   : > { %1650 = vrot.lane.b32.xlu1 %v4144_v28, %s3709_s14  ;;  %v1723_v28 = vmul.f32 %v4175_v45, %v4184_v50 }
 0x329   : > { %2366 = vrot.lane.b32.xlu0 %v4218_v4, %s3708_s11 }
 0x32c   : > { %2368 = vrot.lane.b32.xlu1 %v4223_v5, %s3708_s11 }
 0x32d   : > { %2430 = vrot.lane.b32.xlu0 %v4225_v6, %s3709_s14 }
 0x32f   : > { %v1577_v59 = vpop.permute.xlu0 %1576 }
 0x330   : > { %v1782_v8 = vpop.permute.xlu1 %1781  ;;  %v4359_v13 = vsel %vm306_vm0, %v4182_v49, %v1577_v59  ;;  %v1829_v19 = vsel %vm306_vm0, %v1721_v48, %v1577_v59  ;;  %2432 = vrot.lane.b32.xlu1 %v4152_v31, %s3709_s14  ;;  %v1180_v31 = vadd.s32 64, %v4087_v52  ;;  %v4385_v49 = vsel %vm1386_vm3, 1.0, %v3705_v0  ;;  %v4456_v48 = vld [vmem:[#allocation2 + $0x57] sm:$0xff] }
 0x331   : > { %1652 = vrot.lane.b32.xlu0 %v4209_v63, %s3709_s14  ;;  %v1845_v22 = vsel %vm1700_vm1, %v1829_v19, %v1782_v8  ;;  %v1498_v5 = vmul.f32 %v4385_v49, %v4299_v47 }
 0x332   : > { %3502 = vmatprep.mubr.msk.f32.mxu0 %vm1864_vm2, %v1845_v22  ;;  %v1248_v54 = vand.u32 15, %v1180_v31  ;;  %v4486_v31 = vld [vmem:[#allocation2 + $0x5f] sm:$0xff] }
 0x333   : > { %v1579_v24 = vpop.permute.xlu0 %1578 }
 0x334   : > { %1654 = vrot.lane.b32.xlu1 %v4161_v36, %s3709_s14  ;;  %v1583_v27 = vpop.permute.xlu1 %1582  ;;  %v4388_v45 = vsel %vm306_vm0, %v1479_v32, %v1579_v24  ;;  %vm1388_vm4 = vcmp.ne.s32.totalorder %v1248_v54, 0 }
 0x335   : > { %2370 = vrot.lane.b32.xlu0 %v4231_v9, %s3708_s11  ;;  %v1725_v9 = vmul.f32 %v4193_v57, %v4299_v47  ;;  %v4426_v18 = vsel %vm1388_vm4, 1.0, %v3705_v0  ;;  %v1182_v47 = vadd.s32 80, %v4087_v52 }
 0x337   : > { %v1581_v37 = vpop.permute.xlu0 %1580 }
 0x338   : > { %v4377_v39 = vsel %vm306_vm0, %v4200_v60, %v1581_v37  ;;  %2372 = vrot.lane.b32.xlu1 %v4236_v10, %s3708_s11  ;;  %v1831_v36 = vsel %vm306_vm0, %v1723_v28, %v1581_v37  ;;  %v4410_v10 = vsel %vm306_vm0, %v4390_v61, %v1583_v27  ;;  %v4484_v28 = vld [vmem:[#allocation2 + $0x67] sm:$0xff] }
 0x339   : > { %2434 = vrot.lane.b32.xlu0 %v4238_v11, %s3709_s14 }
 0x33a   : > { %v1784_v50 = vpop.permute.xlu1 %1783 }
 0x33b   : > { %v1846_v60 = vsel %vm1700_vm1, %v4388_v45, %v1784_v50  ;;  %v1786_v63 = vpop.permute.xlu0 %1785 }
 0x33c   : > { %v1847_v4 = vsel %vm1700_vm1, %v1831_v36, %v1786_v63  ;;  %3503 = vmatmul.mubr.msk.f32.vlgmr.msra.gmra.mxu0 %vm1864_vm2, %v1846_v60  ;;  %2436 = vrot.lane.b32.xlu1 %v4168_v41, %s3709_s14  ;;  %v2304_v60 = vld [vmem:[#allocation2 + $0x98] sm:$0xff] }
 0x33d   : > { %1656 = vrot.lane.b32.xlu0 %v4225_v6, %s3709_s14  ;;  %3505 = vmatprep.mubr.msk.f32.mxu0 %vm1864_vm2, %v1847_v4 }
 0x33e   : > { %v1788_v41 = vpop.permute.xlu1 %1787  ;;  %3555 = vmatpush3.msk.msra.mxu0 %vm1913_vm8, %v4290_v38 }
 0x33f   : > { %v1848_v12 = vsel %vm1700_vm1, %v4410_v10, %v1788_v41  ;;  %v1585_v17 = vpop.permute.xlu0 %1584  ;;  %3556 = vmatprep.subr.mxu0 %v3229_v7  ;;  %v2320_v41 = vld [vmem:[#allocation2 + $0x99] sm:$0xff] }
 0x340   : > { %v4417_v6 = vsel %vm306_vm0, %v1498_v5, %v1585_v17  ;;  %3506 = vmatmul.mubr.msk.f32.gmra.mxu0 %vm1864_vm2, %v1848_v12  ;;  %1658 = vrot.lane.b32.xlu1 %v4170_v42, %s3709_s14  ;;  %v1833_v57 = vsel %vm306_vm0, %v1725_v9, %v1585_v17  ;;  %v1500_v42 = vmul.f32 %v4426_v18, %v4316_v3  ;;  %v1186_v5 = vadd.s32 112, %v4087_v52  ;;  %v4514_v12 = vld [vmem:[#allocation2 + $0x77] sm:$0xff]  ;;  %v4516_v17 = vld [vmem:[#allocation2 + $0x6f] sm:$0xff] }
 0x341   : > { %2374 = vrot.lane.b32.xlu0 %v4244_v14, %s3708_s11  ;;  %3557 = vmatpush3.msra.mxu0 %v3229_v7  ;;  %v1727_v14 = vmul.f32 %v4385_v49, %v4316_v3  ;;  %v2321_v7 = vld [vmem:[#allocation2 + $0xa1] sm:$0xff] }
 0x342   : > { %v1587_v21 = vpop.permute.xlu1 %1586 }
 0x343   : > { %v1790_v34 = vpop.permute.xlu0 %1789  ;;  %v4442_v38 = vsel %vm306_vm0, %v4428_v26, %v1587_v21 }
 0x344   : > { %v1849_v35 = vsel %vm1700_vm1, %v1833_v57, %v1790_v34  ;;  %2376 = vrot.lane.b32.xlu1 %v4249_v15, %s3708_s11  ;;  %v2337_v34 = vmul.f32 %v4207_v62, %v2321_v7  ;;  %v1477_v7 = vld [vmem:[#allocation2 + $0xf] sm:$0xff] }
 0x345   : > { %2438 = vrot.lane.b32.xlu0 %v4251_v16, %s3709_s14  ;;  %3508 = vmatprep.mubr.msk.f32.mxu0 %vm1864_vm2, %v1849_v35 }
 0x346   : > { %v1792_v40 = vpop.permute.xlu1 %1791 }
 0x347   : > { %v1850_v43 = vsel %vm1700_vm1, %v4442_v38, %v1792_v40  ;;  %v1589_v15 = vpop.permute.xlu0 %1588 }
 0x348   : > { %v4447_v44 = vsel %vm306_vm0, %v1500_v42, %v1589_v15  ;;  %3509 = vmatmul.mubr.msk.f32.gmra.mxu0 %vm1864_vm2, %v1850_v43  ;;  %2440 = vrot.lane.b32.xlu1 %v4186_v53, %s3709_s14  ;;  %v1835_v46 = vsel %vm306_vm0, %v1727_v14, %v1589_v15  ;;  %v1262_v53 = vand.u32 15, %v1182_v47  ;;  %v4542_v47 = vld [vmem:[#allocation2 + $0x7f] sm:$0xff] }
 0x349   : > { %1660 = vrot.lane.b32.xlu0 %v4238_v11, %s3709_s14  ;;  %v1729_v11 = vmul.f32 %v4426_v18, %v4456_v48 }
 0x34a   : > { %v1591_v3 = vpop.permute.xlu1 %1590  ;;  %vm1390_vm5 = vcmp.ne.s32.totalorder %v1262_v53, 0 }
 0x34b   : > { %v1794_v59 = vpop.permute.xlu0 %1793  ;;  %v4470_v19 = vsel %vm306_vm0, %v4458_v51, %v1591_v3  ;;  %v4489_v37 = vsel %vm1390_vm5, 1.0, %v3705_v0 }
 0x34c   : > { %v1851_v8 = vsel %vm1700_vm1, %v1835_v46, %v1794_v59  ;;  %1662 = vrot.lane.b32.xlu1 %v4190_v56, %s3709_s14  ;;  %v1731_v36 = vmul.f32 %v4489_v37, %v4484_v28  ;;  %v4540_v46 = vld [vmem:[#allocation2 + $0x87] sm:$0xff] }
 0x34d   : > { %2378 = vrot.lane.b32.xlu0 %v4258_v20, %s3708_s11  ;;  %3511 = vmatprep.mubr.msk.f32.mxu0 %vm1864_vm2, %v1851_v8  ;;  %v1184_v20 = vadd.s32 96, %v4087_v52  ;;  %v1290_v52 = vand.u32 15, %v1186_v5 }
 0x34e   : > { %v1796_v22 = vpop.permute.xlu1 %1795 }
 0x34f   : > { %v1852_v23 = vsel %vm1700_vm1, %v4470_v19, %v1796_v22  ;;  %v4474_v24 = vpop.permute.xlu0 %1592  ;;  %vm1394_vm7 = vcmp.ne.s32.totalorder %v1290_v52, 0 }
 0x350   : > { %3512 = vmatmul.mubr.msk.f32.gmra.mxu0 %vm1864_vm2, %v1852_v23  ;;  %2380 = vrot.lane.b32.xlu1 %v4267_v25, %s3708_s11  ;;  %v1837_v56 = vsel %vm306_vm0, %v1729_v11, %v4474_v24  ;;  %v4545_v59 = vsel %vm1394_vm7, 1.0, %v3705_v0 }
 0x351   : > { %2442 = vrot.lane.b32.xlu0 %v4273_v29, %s3709_s14  ;;  %v1276_v29 = vand.u32 15, %v1184_v20  ;;  %v1735_v53 = vmul.f32 %v4545_v59, %v4540_v46 }
 0x352   : > { %v1595_v27 = vpop.permute.xlu1 %1594 }
 0x353   : > { %v1798_v32 = vpop.permute.xlu0 %1797  ;;  %v4501_v50 = vsel %vm306_vm0, %v4486_v31, %v1595_v27  ;;  %vm1392_vm6 = vcmp.ne.s32.totalorder %v1276_v29, 0  ;;  %v1476_v29 = vld [vmem:[#allocation2 + $0x7] sm:$0xff] }
 0x354   : > { %v1853_v25 = vsel %vm1700_vm1, %v1837_v56, %v1798_v32  ;;  %2444 = vrot.lane.b32.xlu1 %v4195_v58, %s3709_s14  ;;  %v4519_v21 = vsel %vm1392_vm6, 1.0, %v3705_v0  ;;  %v4559_v32 = vld [vmem:[#allocation2 + $0x8f] sm:$0xff] }
 0x355   : > { %1664 = vrot.lane.b32.xlu0 %v4251_v16, %s3709_s14  ;;  %3514 = vmatprep.mubr.msk.f32.mxu0 %vm1864_vm2, %v1853_v25  ;;  %v2305_v16 = vld [vmem:[#allocation2 + $0xa0] sm:$0xff]  ;;  %v1733_v35 = vmul.f32 %v4519_v21, %v4514_v12 }
 0x356   : > { %v1800_v54 = vpop.permute.xlu1 %1799 }
 0x357   : > { %v1854_v63 = vsel %vm1700_vm1, %v4501_v50, %v1800_v54  ;;  %v4505_v4 = vpop.permute.xlu0 %1596 }
 0x358   : > { %3515 = vmatmul.mubr.msk.f32.gmra.mxu0 %vm1864_vm2, %v1854_v63  ;;  %1666 = vrot.lane.b32.xlu1 %v4212_v1, %s3709_s14  ;;  %v1839_v58 = vsel %vm306_vm0, %v1731_v36, %v4505_v4 }
 0x359   : > { %2382 = vrot.lane.b32.xlu0 %v2304_v60, %s3708_s11  ;;  %v1492_v60 = vmul.f32 %v4276_v30, %v1476_v29 }
 0x35a   : > { %v1599_v9 = vpop.permute.xlu1 %1598 }
 0x35b   : > { %v1802_v57 = vpop.permute.xlu0 %1801  ;;  %v4530_v42 = vsel %vm306_vm0, %v4516_v17, %v1599_v9 }
 0x35c   : > { %v1855_v1 = vsel %vm1700_vm1, %v1839_v58, %v1802_v57  ;;  %2384 = vrot.lane.b32.xlu1 %v2305_v16, %s3708_s11 }
 0x35d   : > { %2446 = vrot.lane.b32.xlu0 %v2320_v41, %s3709_s14  ;;  %3517 = vmatprep.mubr.msk.f32.mxu0 %vm1864_vm2, %v1855_v1 }
 0x35e   : > { %v1804_v14 = vpop.permute.xlu1 %1803 }
 0x35f   : > { %v1856_v40 = vsel %vm1700_vm1, %v4530_v42, %v1804_v14  ;;  %v4534_v43 = vpop.permute.xlu0 %1600 }
 0x360   : > { %3518 = vmatmul.mubr.msk.f32.gmra.mxu0 %vm1864_vm2, %v1856_v40  ;;  %2448 = vrot.lane.b32.xlu1 %v2337_v34, %s3709_s14  ;;  %v1841_v62 = vsel %vm306_vm0, %v1733_v35, %v4534_v43 }
 0x362   : > { %v1603_v15 = vpop.permute.xlu1 %1602 }
 0x363   : > { %v1806_v3 = vpop.permute.xlu0 %1805  ;;  %v4553_v11 = vsel %vm306_vm0, %v4542_v47, %v1603_v15 }
 0x364   : > { %v1857_v8 = vsel %vm1700_vm1, %v1841_v62, %v1806_v3 }
 0x365   : > { %3520 = vmatprep.mubr.msk.f32.mxu0 %vm1864_vm2, %v1857_v8 }
 0x366   : > { %v1808_v22 = vpop.permute.xlu1 %1807 }
 0x367   : > { %v1858_v23 = vsel %vm1700_vm1, %v4553_v11, %v1808_v22  ;;  %v1760_v56 = vpop.permute.xlu0 %1759 }
 0x368   : > { %3521 = vmatmul.mubr.msk.f32.gmra.mxu0 %vm1864_vm2, %v1858_v23  ;;  %v1843_v0 = vsel %vm306_vm0, %v1735_v53, %v1760_v56 }
 0x36a   : > { %v1762_v20 = vpop.permute.xlu1 %1761 }
 0x36b   : > { %v1810_v27 = vpop.permute.xlu0 %1809  ;;  %v1844_v54 = vsel %vm306_vm0, %v4559_v32, %v1762_v20 }
 0x36c   : > { %v1859_v25 = vsel %vm1700_vm1, %v1843_v0, %v1810_v27 }
 0x36d   : > { %3523 = vmatprep.mubr.msk.f32.mxu0 %vm1864_vm2, %v1859_v25 }
 0x36e   : > { %v1573_v36 = vpop.permute.xlu1 %1572 }
 0x36f   : > { %v1812_v63 = vpop.permute.xlu0 %1811  ;;  %v1684_v5 = vsel %vm306_vm0, %v1492_v60, %v1573_v36 }
 0x370   : > { %v1860_v58 = vsel %vm1700_vm1, %v1844_v54, %v1812_v63 }
 0x371   : > { %3524 = vmatmul.mubr.msk.f32.gmra.mxu0 %vm1864_vm2, %v1860_v58 }
 0x372   : > { %v1575_v16 = vpop.permute.xlu1 %1574 }
 0x373   : > { %v1637_v9 = vpop.permute.xlu0 %1636  ;;  %v1685_v57 = vsel %vm306_vm0, %v1477_v7, %v1575_v16 }
 0x374   : > { %v1701_v41 = vsel %vm1700_vm1, %v1684_v5, %v1637_v9 }
 0x375   : > { %3530 = vmatprep.mubr.msk.f32.mxu1 %vm1864_vm2, %v1701_v41 }
 0x376   : > { %v1639_v1 = vpop.permute.xlu1 %1638 }
 0x377   : > { %v1702_v34 = vsel %vm1700_vm1, %v1685_v57, %v1639_v1  ;;  %v2355_v30 = vpop.permute.xlu0 %2354 }
 0x378   : > { %3531 = vmatmul.mubr.msk.f32.vlgmr.msra.gmra.mxu1 %vm1864_vm2, %v1702_v34  ;;  %v2466_v52 = vsel %vm306_vm0, %v4280_v33, %v2355_v30 }
 0x37a   : > { %v2357_v35 = vpop.permute.xlu1 %2356 }
 0x37b   : > { %v2419_v14 = vpop.permute.xlu0 %2418  ;;  %v2467_v62 = vsel %vm306_vm0, %v4390_v61, %v2357_v35 }
 0x37c   : > { %v2482_v40 = vsel %vm1700_vm1, %v2466_v52, %v2419_v14  ;;  %v2282_v14 = vmul.f32 %v4426_v18, %v4484_v28 }
 0x37d   : > { %3558 = vmatprep.mubr.msk.f32.mxu0 %vm1864_vm2, %v2482_v40 }
 0x37e   : > { %v2421_v15 = vpop.permute.xlu1 %2420 }
 0x37f   : > { %v2483_v3 = vsel %vm1700_vm1, %v2467_v62, %v2421_v15  ;;  %v1641_v8 = vpop.permute.xlu0 %1640 }
 0x380   : > { %v1703_v53 = vsel %vm1700_vm1, %v4359_v13, %v1641_v8  ;;  %3559 = vmatmul.mubr.msk.f32.vlgmr.msra.gmra.mxu0 %vm1864_vm2, %v2483_v3 }
 0x381   : > { %3533 = vmatprep.mubr.msk.f32.mxu1 %vm1864_vm2, %v1703_v53 }
 0x382   : > { %v1643_v33 = vpop.permute.xlu1 %1642 }
 0x383   : > { %v1704_v22 = vsel %vm1700_vm1, %v4388_v45, %v1643_v33  ;;  %v2359_v23 = vpop.permute.xlu0 %2358 }
 0x384   : > { %3534 = vmatmul.mubr.msk.f32.gmra.mxu1 %vm1864_vm2, %v1704_v22  ;;  %v2468_v61 = vsel %vm306_vm0, %v4303_v55, %v2359_v23 }
 0x386   : > { %v2361_v56 = vpop.permute.xlu1 %2360 }
 0x387   : > { %v2423_v0 = vpop.permute.xlu0 %2422  ;;  %v2469_v13 = vsel %vm306_vm0, %v4428_v26, %v2361_v56 }
 0x388   : > { %v2484_v20 = vsel %vm1700_vm1, %v2468_v61, %v2423_v0 }
 0x389   : > { %3561 = vmatprep.mubr.msk.f32.mxu0 %vm1864_vm2, %v2484_v20 }
 0x38a   : > { %v2425_v27 = vpop.permute.xlu1 %2424 }
 0x38b   : > { %v2485_v25 = vsel %vm1700_vm1, %v2469_v13, %v2425_v27  ;;  %v1645_v29 = vpop.permute.xlu0 %1644  ;;  %v1504_v13 = vmul.f32 %v4519_v21, %v4484_v28  ;;  %v2286_v28 = vmul.f32 %v4519_v21, %v4540_v46 }
 0x38c   : > { %v1705_v45 = vsel %vm1700_vm1, %v4377_v39, %v1645_v29  ;;  %3562 = vmatmul.mubr.msk.f32.gmra.mxu0 %vm1864_vm2, %v2485_v25 }
 0x38d   : > { %3536 = vmatprep.mubr.msk.f32.mxu1 %vm1864_vm2, %v1705_v45 }
 0x38e   : > { %v1647_v55 = vpop.permute.xlu1 %1646 }
 0x38f   : > { %v1706_v36 = vsel %vm1700_vm1, %v4410_v10, %v1647_v55  ;;  %v2363_v54 = vpop.permute.xlu0 %2362 }
 0x390   : > { %3537 = vmatmul.mubr.msk.f32.gmra.mxu1 %vm1864_vm2, %v1706_v36  ;;  %v2470_v26 = vsel %vm306_vm0, %v4320_v2, %v2363_v54  ;;  %v2280_v2 = vmul.f32 %v4385_v49, %v4456_v48 }
 0x392   : > { %v2365_v60 = vpop.permute.xlu1 %2364 }
 0x393   : > { %v2427_v63 = vpop.permute.xlu0 %2426  ;;  %v2471_v39 = vsel %vm306_vm0, %v4458_v51, %v2365_v60 }
 0x394   : > { %v2486_v58 = vsel %vm1700_vm1, %v2470_v26, %v2427_v63  ;;  %v1506_v63 = vmul.f32 %v4545_v59, %v4514_v12 }
 0x395   : > { %3564 = vmatprep.mubr.msk.f32.mxu0 %vm1864_vm2, %v2486_v58 }
 0x396   : > { %v2429_v16 = vpop.permute.xlu1 %2428 }
 0x397   : > { %v2487_v5 = vsel %vm1700_vm1, %v2471_v39, %v2429_v16  ;;  %v1649_v7 = vpop.permute.xlu0 %1648  ;;  %v2272_v16 = vld [vmem:[#allocation2 + $0x97] sm:$0xff] }
 0x398   : > { %v1707_v10 = vsel %vm1700_vm1, %v4417_v6, %v1649_v7  ;;  %3565 = vmatmul.mubr.msk.f32.gmra.mxu0 %vm1864_vm2, %v2487_v5 }
 0x399   : > { %3539 = vmatprep.mubr.msk.f32.mxu1 %vm1864_vm2, %v1707_v10 }
 0x39a   : > { %v1651_v9 = vpop.permute.xlu1 %1650 }
 0x39b   : > { %v1708_v41 = vsel %vm1700_vm1, %v4442_v38, %v1651_v9  ;;  %v2367_v57 = vpop.permute.xlu0 %2366 }
 0x39c   : > { %3540 = vmatmul.mubr.msk.f32.gmra.mxu1 %vm1864_vm2, %v1708_v41  ;;  %v2472_v51 = vsel %vm306_vm0, %v2280_v2, %v2367_v57 }
 0x39e   : > { %v2369_v1 = vpop.permute.xlu1 %2368 }
 0x39f   : > { %v2431_v34 = vpop.permute.xlu0 %2430  ;;  %v2473_v30 = vsel %vm306_vm0, %v4486_v31, %v2369_v1 }
 0x3a0   : > { %v2488_v6 = vsel %vm1700_vm1, %v2472_v51, %v2431_v34  ;;  %v2273_v51 = vld [vmem:[#allocation2 + $0x9f] sm:$0xff] }
 0x3a1   : > { %3567 = vmatprep.mubr.msk.f32.mxu0 %vm1864_vm2, %v2488_v6 }
 0x3a2   : > { %v2433_v52 = vpop.permute.xlu1 %2432 }
 0x3a3   : > { %v2489_v49 = vsel %vm1700_vm1, %v2473_v30, %v2433_v52  ;;  %v1653_v35 = vpop.permute.xlu0 %1652 }
 0x3a4   : > { %v1709_v38 = vsel %vm1700_vm1, %v4447_v44, %v1653_v35  ;;  %3568 = vmatmul.mubr.msk.f32.gmra.mxu0 %vm1864_vm2, %v2489_v49  ;;  %v1502_v44 = vmul.f32 %v4489_v37, %v4456_v48  ;;  %v2284_v48 = vmul.f32 %v4489_v37, %v4514_v12  ;;  %v2769_v12 = vld [vmem:[%s4849_s3] sm:$0xf] }
 0x3a5   : > { %3542 = vmatprep.mubr.msk.f32.mxu1 %vm1864_vm2, %v1709_v38  ;;  %3582 = vmatprep.subr.msk.mxu1 %vm1913_vm8, %v2769_v12 }
 0x3a6   : > { %v1655_v40 = vpop.permute.xlu1 %1654  ;;  %3583 = vmatpush3.msk.msra.mxu1 %vm1913_vm8, %v2769_v12 }
 0x3a7   : > { %v1710_v62 = vsel %vm1700_vm1, %v4470_v19, %v1655_v40  ;;  %v2371_v15 = vpop.permute.xlu0 %2370  ;;  %v1694_v19 = vsel %vm306_vm0, %v1502_v44, %v4474_v24 }
 0x3a8   : > { %3543 = vmatmul.mubr.msk.f32.gmra.mxu1 %vm1864_vm2, %v1710_v62  ;;  %v2474_v31 = vsel %vm306_vm0, %v2282_v14, %v2371_v15 }
 0x3aa   : > { %v2373_v3 = vpop.permute.xlu1 %2372 }
 0x3ab   : > { %v2435_v8 = vpop.permute.xlu0 %2434  ;;  %v2475_v18 = vsel %vm306_vm0, %v4516_v17, %v2373_v3 }
 0x3ac   : > { %v2490_v53 = vsel %vm1700_vm1, %v2474_v31, %v2435_v8 }
 0x3ad   : > { %3570 = vmatprep.mubr.msk.f32.mxu0 %vm1864_vm2, %v2490_v53 }
 0x3ae   : > { %v2437_v33 = vpop.permute.xlu1 %2436 }
 0x3af   : > { %v2491_v22 = vsel %vm1700_vm1, %v2475_v18, %v2437_v33  ;;  %v1657_v23 = vpop.permute.xlu0 %1656 }
 0x3b0   : > { %v1711_v61 = vsel %vm1700_vm1, %v1694_v19, %v1657_v23  ;;  %3571 = vmatmul.mubr.msk.f32.gmra.mxu0 %vm1864_vm2, %v2491_v22 }
 0x3b1   : > { %3545 = vmatprep.mubr.msk.f32.mxu1 %vm1864_vm2, %v1711_v61 }
 0x3b2   : > { %v1659_v56 = vpop.permute.xlu1 %1658 }
 0x3b3   : > { %v1712_v17 = vsel %vm1700_vm1, %v4501_v50, %v1659_v56  ;;  %v2375_v0 = vpop.permute.xlu0 %2374  ;;  %v1696_v50 = vsel %vm306_vm0, %v1504_v13, %v4505_v4 }
 0x3b4   : > { %3546 = vmatmul.mubr.msk.f32.gmra.mxu1 %vm1864_vm2, %v1712_v17  ;;  %v2476_v24 = vsel %vm306_vm0, %v2284_v48, %v2375_v0  ;;  %v4716_v17 = vld [vmem:[%s4851_s5] ss:$0 sm:$0xff] }
 0x3b6   : > { %v2377_v20 = vpop.permute.xlu1 %2376 }
 0x3b7   : > { %v2439_v27 = vpop.permute.xlu0 %2438  ;;  %v2477_v37 = vsel %vm306_vm0, %v4542_v47, %v2377_v20 }
 0x3b8   : > { %v2492_v25 = vsel %vm1700_vm1, %v2476_v24, %v2439_v27 }
 0x3b9   : > { %3573 = vmatprep.mubr.msk.f32.mxu0 %vm1864_vm2, %v2492_v25 }
 0x3ba   : > { %v2441_v29 = vpop.permute.xlu1 %2440 }
 0x3bb   : > { %v2493_v45 = vsel %vm1700_vm1, %v2477_v37, %v2441_v29  ;;  %v1661_v55 = vpop.permute.xlu0 %1660 }
 0x3bc   : > { %v1713_v36 = vsel %vm1700_vm1, %v1696_v50, %v1661_v55  ;;  %3574 = vmatmul.mubr.msk.f32.gmra.mxu0 %vm1864_vm2, %v2493_v45 }
 0x3bd   : > { %3548 = vmatprep.mubr.msk.f32.mxu1 %vm1864_vm2, %v1713_v36 }
 0x3be   : > { %v1663_v54 = vpop.permute.xlu1 %1662 }
 0x3bf   : > { %v1714_v47 = vsel %vm1700_vm1, %v4530_v42, %v1663_v54  ;;  %v2379_v26 = vpop.permute.xlu0 %2378  ;;  %v1698_v42 = vsel %vm306_vm0, %v1506_v63, %v4534_v43 }
 0x3c0   : > { %3549 = vmatmul.mubr.msk.f32.gmra.mxu1 %vm1864_vm2, %v1714_v47  ;;  %v2478_v4 = vsel %vm306_vm0, %v2286_v28, %v2379_v26 }
 0x3c2   : > { %v2381_v60 = vpop.permute.xlu1 %2380 }
 0x3c3   : > { %v2443_v58 = vpop.permute.xlu0 %2442  ;;  %v2479_v21 = vsel %vm306_vm0, %v4559_v32, %v2381_v60  ;;  %v2288_v32 = vmul.f32 %v4545_v59, %v2272_v16 }
 0x3c4   : > { %v2494_v39 = vsel %vm1700_vm1, %v2478_v4, %v2443_v58 }
 0x3c5   : > { %3576 = vmatprep.mubr.msk.f32.mxu0 %vm1864_vm2, %v2494_v39 }
 0x3c6   : > { %v2445_v46 = vpop.permute.xlu1 %2444 }
 0x3c7   : > { %v2495_v5 = vsel %vm1700_vm1, %v2479_v21, %v2445_v46  ;;  %v1665_v7 = vpop.permute.xlu0 %1664 }
 0x3c8   : > { %v1715_v10 = vsel %vm1700_vm1, %v1698_v42, %v1665_v7  ;;  %3577 = vmatmul.mubr.msk.f32.gmra.mxu0 %vm1864_vm2, %v2495_v5 }
 0x3c9   : > { %3551 = vmatprep.mubr.msk.f32.mxu1 %vm1864_vm2, %v1715_v10 }
 0x3ca   : > { %v1667_v43 = vpop.permute.xlu1 %1666 }
 0x3cb   : > { %v1716_v2 = vsel %vm1700_vm1, %v4553_v11, %v1667_v43  ;;  %v2383_v9 = vpop.permute.xlu0 %2382 }
 0x3cc   : > { %3552 = vmatmul.mubr.msk.f32.gmra.mxu1 %vm1864_vm2, %v1716_v2  ;;  %v2480_v41 = vsel %vm306_vm0, %v2288_v32, %v2383_v9 }
 0x3ce   : > { %v2385_v57 = vpop.permute.xlu1 %2384 }
 0x3cf   : > { %v2447_v1 = vpop.permute.xlu0 %2446  ;;  %v2481_v59 = vsel %vm306_vm0, %v2273_v51, %v2385_v57 }
 0x3d0   : > { %v2496_v34 = vsel %vm1700_vm1, %v2480_v41, %v2447_v1 }
 0x3d1   : > { %3579 = vmatprep.mubr.msk.f32.mxu0 %vm1864_vm2, %v2496_v34 }
 0x3d2   : > { %v2449_v6 = vpop.permute.xlu1 %2448 }
 0x3d3   : > { %v2497_v30 = vsel %vm1700_vm1, %v2481_v59, %v2449_v6 }
 0x3d4   : > { %3580 = vmatmul.mubr.msk.f32.gmra.mxu0 %vm1864_vm2, %v2497_v30 }
 0x3fc   : > { %v3504_v11 = vpop.f32.mrf.mxu0 }
 0x3fe   : > { %v1983_v52 = vpop.f32.mrf.mxu0 }
 0x400   : > { %v3507_v49 = vpop.f32.mrf.mxu0 }
 0x402   : > { %v1993_v35 = vpop.f32.mrf.mxu0 }
 0x408   : > { %v3510_v38 = vpop.f32.mrf.mxu0 }
 0x40a   : > { %v2003_v14 = vpop.f32.mrf.mxu0 }
 0x410   : > { %v3513_v40 = vpop.f32.mrf.mxu0 }
 0x412   : > { %v2013_v62 = vpop.f32.mrf.mxu0 }
 0x418   : > { %v4697_v15 = vpop.f32.mrf.mxu0 }
 0x41a   : > { %v4699_v31 = vpop.f32.mrf.mxu0 }
 0x420   : > { %v4701_v3 = vpop.f32.mrf.mxu0 }
 0x422   : > { %v4703_v44 = vpop.f32.mrf.mxu0 }
 0x428   : > { %v4705_v8 = vpop.f32.mrf.mxu0 }
 0x42a   : > { %v4707_v53 = vpop.f32.mrf.mxu0 }
 0x431   : > { %v4709_v18 = vpop.f32.mrf.mxu0 }
 0x433   : > { %v4711_v19 = vpop.f32.mrf.mxu0 }
 0x438   : > { %v3532_v33 = vpop.f32.mrf.mxu1 }
 0x439   : > { %v2185_v23 = vadd.f32 %v3532_v33, %v3504_v11 }
 0x43a   : > { %v2179_v22 = vpop.f32.mrf.mxu1 }
 0x43b   : > { %v2180_v48 = vadd.f32 %v2179_v22, %v1983_v52 }
 0x440   : > { %v3560_v61 = vpop.f32.mrf.mxu0 }
 0x441   : > { %v2698_v56 = vadd.f32 %v3560_v61, %v2185_v23 }
 0x442   : > { %v2618_v0 = vpop.f32.mrf.mxu0 }
 0x443   : > { %v2697_v24 = vadd.f32 %v2618_v0, %v2180_v48  ;;  %v2721_v20 = vadd.f32 %v4716_v17, %v2698_v56 }
 0x444   : > { %v3535_v27 = vpop.f32.mrf.mxu1 }
 0x445   : > { %v2720_v13 = vadd.f32 %v4716_v17, %v2697_v24  ;;  %v2737_v37 = vmax.f32 %v2721_v20, 0.0  ;;  %v2195_v50 = vadd.f32 %v3535_v27, %v3507_v49 }
 0x446   : > { %v2189_v29 = vpop.f32.mrf.mxu1 }
 0x447   : > { %v2736_v25 = vmax.f32 %v2720_v13, 0.0  ;;  %v2190_v55 = vadd.f32 %v2189_v29, %v1993_v35 }
 0x449   : > { %3584 = vmatprep.mubr.msk.f32.mxu1 %vm306_vm0, %v2736_v25 }
 0x44a   : > { %3585 = vmatmul.mubr.msk.f32.vlgmr.msra.gmra.mxu1 %vm306_vm0, %v2737_v37 }
 0x44c   : > { %v3563_v45 = vpop.f32.mrf.mxu0 }
 0x44d   : > { %v2700_v36 = vadd.f32 %v3563_v45, %v2195_v50 }
 0x44e   : > { %v2628_v28 = vpop.f32.mrf.mxu0 }
 0x44f   : > { %v2699_v54 = vadd.f32 %v2628_v28, %v2190_v55  ;;  %v2723_v47 = vadd.f32 %v4716_v17, %v2700_v36 }
 0x450   : > { %v3538_v4 = vpop.f32.mrf.mxu1 }
 0x451   : > { %v2722_v26 = vadd.f32 %v4716_v17, %v2699_v54  ;;  %v2739_v63 = vmax.f32 %v2723_v47, 0.0  ;;  %v2205_v39 = vadd.f32 %v3538_v4, %v3510_v38 }
 0x452   : > { %v2199_v58 = vpop.f32.mrf.mxu1 }
 0x453   : > { %v2738_v60 = vmax.f32 %v2722_v26, 0.0  ;;  %v2200_v46 = vadd.f32 %v2199_v58, %v2003_v14 }
 0x455   : > { %3587 = vmatprep.mubr.msk.f32.mxu1 %vm306_vm0, %v2738_v60 }
 0x456   : > { %3588 = vmatmul.mubr.msk.f32.gmra.mxu1 %vm306_vm0, %v2739_v63 }
 0x458   : > { %v3566_v21 = vpop.f32.mrf.mxu0 }
 0x459   : > { %v2702_v16 = vadd.f32 %v3566_v21, %v2205_v39 }
 0x45a   : > { %v2638_v42 = vpop.f32.mrf.mxu0 }
 0x45b   : > { %v2701_v5 = vadd.f32 %v2638_v42, %v2200_v46  ;;  %v2725_v7 = vadd.f32 %v4716_v17, %v2702_v16 }
 0x45c   : > { %v3541_v10 = vpop.f32.mrf.mxu1 }
 0x45d   : > { %v2724_v12 = vadd.f32 %v4716_v17, %v2701_v5  ;;  %v2741_v43 = vmax.f32 %v2725_v7, 0.0  ;;  %v2215_v9 = vadd.f32 %v3541_v10, %v3513_v40 }
 0x45e   : > { %v2209_v2 = vpop.f32.mrf.mxu1 }
 0x45f   : > { %v2740_v32 = vmax.f32 %v2724_v12, 0.0  ;;  %v2210_v57 = vadd.f32 %v2209_v2, %v2013_v62 }
 0x461   : > { %3590 = vmatprep.mubr.msk.f32.mxu1 %vm306_vm0, %v2740_v32 }
 0x462   : > { %3591 = vmatmul.mubr.msk.f32.gmra.mxu1 %vm306_vm0, %v2741_v43  ;;  %v2753_v43 = vld [vmem:[%s4760_s16] sm:$0xff] }
 0x464   : > { %v3569_v41 = vpop.f32.mrf.mxu0 }
 0x465   : > { %v2704_v51 = vadd.f32 %v3569_v41, %v2215_v9 }
 0x466   : > { %v2648_v1 = vpop.f32.mrf.mxu0 }
 0x467   : > { %v2703_v34 = vadd.f32 %v2648_v1, %v2210_v57  ;;  %v2727_v59 = vadd.f32 %v4716_v17, %v2704_v51 }
 0x468   : > { %v3544_v30 = vpop.f32.mrf.mxu1 }
 0x469   : > { %v2726_v6 = vadd.f32 %v4716_v17, %v2703_v34  ;;  %v2743_v52 = vmax.f32 %v2727_v59, 0.0  ;;  %v2225_v35 = vadd.f32 %v3544_v30, %v4697_v15  ;;  %v2756_v34 = vld [vmem:[%s4760_s16 + $0x18] sm:$0xff]  ;;  %v2755_v30 = vld [vmem:[%s4760_s16 + $0x10] sm:$0xff] }
 0x46a   : > { %v2219_v49 = vpop.f32.mrf.mxu1 }
 0x46b   : > { %v2742_v11 = vmax.f32 %v2726_v6, 0.0  ;;  %v2220_v14 = vadd.f32 %v2219_v49, %v4699_v31 }
 0x46d   : > { %3593 = vmatprep.mubr.msk.f32.mxu1 %vm306_vm0, %v2742_v11 }
 0x46e   : > { %3594 = vmatmul.mubr.msk.f32.gmra.mxu1 %vm306_vm0, %v2743_v52 }
 0x470   : > { %v3572_v38 = vpop.f32.mrf.mxu0 }
 0x471   : > { %v2706_v40 = vadd.f32 %v3572_v38, %v2225_v35 }
 0x472   : > { %v2658_v62 = vpop.f32.mrf.mxu0 }
 0x473   : > { %v2705_v33 = vadd.f32 %v2658_v62, %v2220_v14  ;;  %v2729_v22 = vadd.f32 %v4716_v17, %v2706_v40  ;;  %v2758_v40 = vld [vmem:[%s4760_s16 + $0x28] sm:$0xff] }
 0x474   : > { %v3547_v61 = vpop.f32.mrf.mxu1 }
 0x475   : > { %v2728_v23 = vadd.f32 %v4716_v17, %v2705_v33  ;;  %v2745_v56 = vmax.f32 %v2729_v22, 0.0  ;;  %v2235_v15 = vadd.f32 %v3547_v61, %v4701_v3  ;;  %v2757_v22 = vld [vmem:[%s4760_s16 + $0x20] sm:$0xff] }
 0x476   : > { %v2229_v0 = vpop.f32.mrf.mxu1 }
 0x477   : > { %v2744_v48 = vmax.f32 %v2728_v23, 0.0  ;;  %v2230_v31 = vadd.f32 %v2229_v0, %v4703_v44 }
 0x479   : > { %3596 = vmatprep.mubr.msk.f32.mxu1 %vm306_vm0, %v2744_v48 }
 0x47a   : > { %3597 = vmatmul.mubr.msk.f32.gmra.mxu1 %vm306_vm0, %v2745_v56 }
 0x47c   : > { %v3575_v24 = vpop.f32.mrf.mxu0 }
 0x47d   : > { %v2708_v20 = vadd.f32 %v3575_v24, %v2235_v15  ;;  %v2760_v24 = vld [vmem:[%s4760_s16 + $0x38] sm:$0xff] }
 0x47e   : > { %v2668_v13 = vpop.f32.mrf.mxu0 }
 0x47f   : > { %v2707_v27 = vadd.f32 %v2668_v13, %v2230_v31  ;;  %v2731_v25 = vadd.f32 %v4716_v17, %v2708_v20  ;;  %v2759_v13 = vld [vmem:[%s4760_s16 + $0x30] sm:$0xff] }
 0x480   : > { %v3550_v29 = vpop.f32.mrf.mxu1 }
 0x481   : > { %v2730_v37 = vadd.f32 %v4716_v17, %v2707_v27  ;;  %v2747_v45 = vmax.f32 %v2731_v25, 0.0  ;;  %v2245_v3 = vadd.f32 %v3550_v29, %v4705_v8 }
 0x482   : > { %v2239_v55 = vpop.f32.mrf.mxu1 }
 0x483   : > { %v2746_v50 = vmax.f32 %v2730_v37, 0.0  ;;  %v2240_v44 = vadd.f32 %v2239_v55, %v4707_v53  ;;  %v2762_v55 = vld [vmem:[%s4760_s16 + $0x48] sm:$0xff] }
 0x485   : > { %3599 = vmatprep.mubr.msk.f32.mxu1 %vm306_vm0, %v2746_v50 }
 0x486   : > { %3600 = vmatmul.mubr.msk.f32.gmra.mxu1 %vm306_vm0, %v2747_v45 }
 0x488   : > { %v3578_v36 = vpop.f32.mrf.mxu0 }
 0x489   : > { %v2710_v28 = vadd.f32 %v3578_v36, %v2245_v3 }
 0x48a   : > { %v2678_v54 = vpop.f32.mrf.mxu0 }
 0x48b   : > { %v2709_v47 = vadd.f32 %v2678_v54, %v2240_v44  ;;  %v2733_v26 = vadd.f32 %v4716_v17, %v2710_v28  ;;  %v2761_v44 = vld [vmem:[%s4760_s16 + $0x40] sm:$0xff] }
 0x48c   : > { %v3553_v60 = vpop.f32.mrf.mxu1 }
 0x48d   : > { %v2732_v4 = vadd.f32 %v4716_v17, %v2709_v47  ;;  %v2749_v58 = vmax.f32 %v2733_v26, 0.0  ;;  %v2255_v8 = vadd.f32 %v3553_v60, %v4709_v18  ;;  %v4765_v18 = vld [vmem:[%s4852_s6] ss:$0 sm:$0xff] }
 0x48e   : > { %v2249_v39 = vpop.f32.mrf.mxu1 }
 0x48f   : > { %v2748_v63 = vmax.f32 %v2732_v4, 0.0  ;;  %v2250_v21 = vadd.f32 %v2249_v39, %v4711_v19  ;;  %v2754_v19 = vld [vmem:[%s4760_s16 + $0x8] sm:$0xff] }
 0x491   : > { %3602 = vmatprep.mubr.msk.f32.mxu1 %vm306_vm0, %v2748_v63  ;;  %v2764_v63 = vld [vmem:[%s4760_s16 + $0x58] sm:$0xff] }
 0x492   : > { %3603 = vmatmul.mubr.msk.f32.gmra.mxu1 %vm306_vm0, %v2749_v58 }
 0x494   : > { %v3581_v53 = vpop.f32.mrf.mxu0 }
 0x495   : > { %v2712_v46 = vadd.f32 %v3581_v53, %v2255_v8  ;;  %v2763_v8 = vld [vmem:[%s4760_s16 + $0x50] sm:$0xff] }
 0x496   : > { %v2688_v16 = vpop.f32.mrf.mxu0 }
 0x497   : > { %v2711_v42 = vadd.f32 %v2688_v16, %v2250_v21  ;;  %v2735_v5 = vadd.f32 %v4716_v17, %v2712_v46 }
 0x499   : > { %v2734_v7 = vadd.f32 %v4716_v17, %v2711_v42  ;;  %v2751_v10 = vmax.f32 %v2735_v5, 0.0 }
 0x49b   : > { %v2750_v12 = vmax.f32 %v2734_v7, 0.0  ;;  %v2766_v7 = vld [vmem:[%s4760_s16 + $0x68] sm:$0xff] }
 0x49d   : > { %3605 = vmatprep.mubr.msk.f32.mxu1 %vm306_vm0, %v2750_v12 }
 0x49e   : > { %3606 = vmatmul.mubr.msk.f32.gmra.mxu1 %vm306_vm0, %v2751_v10  ;;  %vm3005_vm0 = vcmask 130048  }
 0x50a   : > { %v3586_v17 = vpop.f32.mrf.mxu1 }
 0x50b   : > { %v2900_v32 = vadd.f32 %v3586_v17, %v4765_v18 }
 0x50c   : > { %v2894_v2 = vpop.f32.mrf.mxu1 }
 0x50d   : > { %v2974_v9 = vadd.f32 %v2900_v32, %v2754_v19  ;;  %v2895_v41 = vadd.f32 %v4765_v18, %v2894_v2  ;;  %v2765_v19 = vld [vmem:[%s4760_s16 + $0x60] sm:$0xff] }
 0x50f   : > { %v2990_v57 = vmax.f32 %v2974_v9, 0.0  ;;  %v2973_v51 = vadd.f32 %v2895_v41, %v2753_v43 }
 0x511   : > { %3007 = vst.msk [vmem:[%s3801_s21 + $0x8] sm:$0xff] %vm3005_vm0, %v2990_v57  ;;  %v2989_v1 = vmax.f32 %v2973_v51, 0.0  ;;  %v2768_v57 = vld [vmem:[%s4760_s16 + $0x78] sm:$0xff] }
 0x513   : > { %3006 = vst.msk [vmem:[%s3801_s21] sm:$0xff] %vm3005_vm0, %v2989_v1 }
 0x516   : > { %v3589_v59 = vpop.f32.mrf.mxu1 }
 0x517   : > { %v2910_v6 = vadd.f32 %v3589_v59, %v4765_v18 }
 0x518   : > { %v2904_v11 = vpop.f32.mrf.mxu1 }
 0x519   : > { %v2976_v52 = vadd.f32 %v2910_v6, %v2756_v34  ;;  %v2905_v49 = vadd.f32 %v4765_v18, %v2904_v11  ;;  %v2767_v34 = vld [vmem:[%s4760_s16 + $0x70] sm:$0xff] }
 0x51b   : > { %v2992_v35 = vmax.f32 %v2976_v52, 0.0  ;;  %v2975_v38 = vadd.f32 %v2905_v49, %v2755_v30 }
 0x51d   : > { %3009 = vst.msk [vmem:[%s3801_s21 + $0x18] sm:$0xff] %vm3005_vm0, %v2992_v35  ;;  %v2991_v14 = vmax.f32 %v2975_v38, 0.0 }
 0x51f   : > { %3008 = vst.msk [vmem:[%s3801_s21 + $0x10] sm:$0xff] %vm3005_vm0, %v2991_v14 }
 0x522   : > { %v3592_v62 = vpop.f32.mrf.mxu1 }
 0x523   : > { %v2920_v33 = vadd.f32 %v3592_v62, %v4765_v18 }
 0x524   : > { %v2914_v23 = vpop.f32.mrf.mxu1 }
 0x525   : > { %v2978_v61 = vadd.f32 %v2920_v33, %v2758_v40  ;;  %v2915_v48 = vadd.f32 %v4765_v18, %v2914_v23 }
 0x527   : > { %v2994_v56 = vmax.f32 %v2978_v61, 0.0  ;;  %v2977_v0 = vadd.f32 %v2915_v48, %v2757_v22 }
 0x529   : > { %3011 = vst.msk [vmem:[%s3801_s21 + $0x28] sm:$0xff] %vm3005_vm0, %v2994_v56  ;;  %v2993_v15 = vmax.f32 %v2977_v0, 0.0 }
 0x52b   : > { %3010 = vst.msk [vmem:[%s3801_s21 + $0x20] sm:$0xff] %vm3005_vm0, %v2993_v15 }
 0x52e   : > { %v3595_v31 = vpop.f32.mrf.mxu1 }
 0x52f   : > { %v2930_v20 = vadd.f32 %v3595_v31, %v4765_v18 }
 0x530   : > { %v2924_v27 = vpop.f32.mrf.mxu1 }
 0x531   : > { %v2980_v25 = vadd.f32 %v2930_v20, %v2760_v24  ;;  %v2925_v37 = vadd.f32 %v4765_v18, %v2924_v27 }
 0x533   : > { %v2996_v29 = vmax.f32 %v2980_v25, 0.0  ;;  %v2979_v50 = vadd.f32 %v2925_v37, %v2759_v13 }
 0x535   : > { %3013 = vst.msk [vmem:[%s3801_s21 + $0x38] sm:$0xff] %vm3005_vm0, %v2996_v29  ;;  %v2995_v45 = vmax.f32 %v2979_v50, 0.0 }
 0x537   : > { %3012 = vst.msk [vmem:[%s3801_s21 + $0x30] sm:$0xff] %vm3005_vm0, %v2995_v45 }
 0x53a   : > { %v3598_v3 = vpop.f32.mrf.mxu1 }
 0x53b   : > { %v2940_v36 = vadd.f32 %v3598_v3, %v4765_v18 }
 0x53c   : > { %v2934_v28 = vpop.f32.mrf.mxu1 }
 0x53d   : > { %v2982_v54 = vadd.f32 %v2940_v36, %v2762_v55  ;;  %v2935_v47 = vadd.f32 %v4765_v18, %v2934_v28 }
 0x53f   : > { %v2998_v26 = vmax.f32 %v2982_v54, 0.0  ;;  %v2981_v4 = vadd.f32 %v2935_v47, %v2761_v44 }
 0x541   : > { %3015 = vst.msk [vmem:[%s3801_s21 + $0x48] sm:$0xff] %vm3005_vm0, %v2998_v26  ;;  %v2997_v60 = vmax.f32 %v2981_v4, 0.0 }
 0x543   : > { %3014 = vst.msk [vmem:[%s3801_s21 + $0x40] sm:$0xff] %vm3005_vm0, %v2997_v60 }
 0x546   : > { %v3601_v58 = vpop.f32.mrf.mxu1 }
 0x547   : > { %v2950_v39 = vadd.f32 %v3601_v58, %v4765_v18 }
 0x548   : > { %v2944_v53 = vpop.f32.mrf.mxu1 }
 0x549   : > { %v2984_v21 = vadd.f32 %v2950_v39, %v2764_v63  ;;  %v2945_v46 = vadd.f32 %v4765_v18, %v2944_v53 }
 0x54b   : > { %v3000_v16 = vmax.f32 %v2984_v21, 0.0  ;;  %v2983_v42 = vadd.f32 %v2945_v46, %v2763_v8 }
 0x54d   : > { %3017 = vst.msk [vmem:[%s3801_s21 + $0x58] sm:$0xff] %vm3005_vm0, %v3000_v16  ;;  %v2999_v5 = vmax.f32 %v2983_v42, 0.0 }
 0x54f   : > { %3016 = vst.msk [vmem:[%s3801_s21 + $0x50] sm:$0xff] %vm3005_vm0, %v2999_v5 }
 0x552   : > { %v3604_v12 = vpop.f32.mrf.mxu1 }
 0x553   : > { %v2960_v10 = vadd.f32 %v3604_v12, %v4765_v18 }
 0x554   : > { %v2954_v17 = vpop.f32.mrf.mxu1 }
 0x555   : > { %v2986_v32 = vadd.f32 %v2960_v10, %v2766_v7  ;;  %v2955_v43 = vadd.f32 %v4765_v18, %v2954_v17 }
 0x557   : > { %v3002_v2 = vmax.f32 %v2986_v32, 0.0  ;;  %v2985_v9 = vadd.f32 %v2955_v43, %v2765_v19 }
 0x559   : > { %3019 = vst.msk [vmem:[%s3801_s21 + $0x68] sm:$0xff] %vm3005_vm0, %v3002_v2  ;;  %v3001_v41 = vmax.f32 %v2985_v9, 0.0 }
 0x55b   : > { %3018 = vst.msk [vmem:[%s3801_s21 + $0x60] sm:$0xff] %vm3005_vm0, %v3001_v41 }
 0x55e   : > { %v3607_v51 = vpop.f32.mrf.mxu1 }
 0x55f   : > { %v2970_v1 = vadd.f32 %v3607_v51, %v4765_v18 }
 0x560   : > { %v2964_v59 = vpop.f32.mrf.mxu1 }
 0x561   : > { %v2988_v6 = vadd.f32 %v2970_v1, %v2768_v57  ;;  %v2965_v30 = vadd.f32 %v4765_v18, %v2964_v59 }
 0x563   : > { %v3004_v11 = vmax.f32 %v2988_v6, 0.0  ;;  %v2987_v52 = vadd.f32 %v2965_v30, %v2767_v34 }
 0x565   : > { %3021 = vst.msk [vmem:[%s3801_s21 + $0x78] sm:$0xff] %vm3005_vm0, %v3004_v11  ;;  %v3003_v49 = vmax.f32 %v2987_v52, 0.0 }
 0x567   : > { %3020 = vst.msk [vmem:[%s3801_s21 + $0x70] sm:$0xff] %vm3005_vm0, %v3003_v49 }
 0x568 PF: > { %s17_s28 = sadd.s32 1, %s3703_s28   ;;  %s4858_s24 = smov %s3695_s26 }
 0x569   : > { %p14_p12 = scmp.ge.s32.totalorder %s17_s28, 6   ;;  %s4859_s25 = smov %s3699_s27 }
 0x56a   : > { %s4860_s26 = smov %s4863_s29  ;;  %s4861_s27 = smov %s4867_s30 }
 0x56b   :  { %16 = sbr.rel (!%p14_p12) target bundleno = 3 (0x3), region = 96 }

</bundles_post_ra>
